<compile_context>
chip_gen: v7x
topology: tpu7x:2x2x1
jax: 0.10.0
libtpu: 0.0.40
codegen_flags: <defaults>
</compile_context>

<pallas_src>
import math

import jax
import jax.numpy as jnp
from jax.experimental import pallas as pl
from jax.experimental.pallas import tpu as pltpu

NEG_BIG = -1e30  # "minus infinity" that keeps exp()/max() finite-safe


def _atten_mil_kernel(
    n_ref,                      # SMEM (1,) int32 : true instance count N
    x_ref,                      # (N_TILE, D)      instance features (one tile)
    w1_ref, b1_ref,             # (D, H), (1, H)   attention_net[0]
    wa_ref, ba_ref,             # (H, H), (1, H)   Attn_Net_Gated.attention_a
    wb_ref, bb_ref,             # (H, H), (1, H)   Attn_Net_Gated.attention_b
    wc_ref, bc_ref,             # (1, H), (1, 1)   Attn_Net_Gated.attention_c (weight as a row)
    wd_ref, bd_ref,             # (H, H), (1, H)   classifier[0]
    we_ref, be_ref,             # (H, C), (1, C)   classifier[3]
    score_ref,                  # out (1, N_TILE)  raw attention scores (pre-softmax)
    logits_ref,                 # out (1, C)
    m_scr, l_scr, acc_scr,      # VMEM (1,1), (1,1), (1,H) f32 : online-softmax state
):
    i = pl.program_id(0)
    n_tiles = pl.num_programs(0)
    tile_n = x_ref.shape[0]

    @pl.when(i == 0)
    def _init():
        m_scr[...] = jnp.full_like(m_scr, NEG_BIG)
        l_scr[...] = jnp.zeros_like(l_scr)
        acc_scr[...] = jnp.zeros_like(acc_scr)
        logits_ref[...] = jnp.zeros_like(logits_ref)

    x = x_ref[...]
    # Instance embedding: h = ReLU(x @ W1 + b1)   (MXU, f32 accumulate)
    h = jnp.maximum(
        jnp.dot(x, w1_ref[...], preferred_element_type=jnp.float32) + b1_ref[...],
        0.0)
    # Gated attention branch.
    a = jnp.tanh(
        jnp.dot(h, wa_ref[...], preferred_element_type=jnp.float32) + ba_ref[...])
    g = jax.nn.sigmoid(
        jnp.dot(h, wb_ref[...], preferred_element_type=jnp.float32) + bb_ref[...])
    ab = a * g                                                     # (N_TILE, H)

    # Per-instance attention logit, produced lane-dense as a (1, N_TILE) row:
    #   s_row = wc_row @ ab^T + bc   (square transpose -> XLU, matmul -> MXU)
    ab_t = jnp.transpose(ab)                                       # (H, N_TILE)
    s_row = jnp.dot(wc_ref[...], ab_t,
                    preferred_element_type=jnp.float32) + bc_ref[...]   # (1, N_TILE)

    # Mask padded instances of the (possibly partial) last tile.
    col = jax.lax.broadcasted_iota(jnp.int32, (1, tile_n), 1) + i * tile_n
    s_row = jnp.where(col < n_ref[0], s_row, NEG_BIG)
    score_ref[...] = s_row.astype(score_ref.dtype)

    # Online softmax-weighted pooling: pooled = softmax(s over all N) @ h.
    m_old = m_scr[...]
    m_new = jnp.maximum(m_old, jnp.max(s_row, axis=1, keepdims=True))   # (1, 1)
    alpha = jnp.exp(m_old - m_new)
    p_row = jnp.exp(s_row - m_new)                                      # (1, N_TILE)
    l_scr[...] = alpha * l_scr[...] + jnp.sum(p_row, axis=1, keepdims=True)
    acc_scr[...] = alpha * acc_scr[...] + jnp.dot(
        p_row, h, preferred_element_type=jnp.float32)                   # (1, H)
    m_scr[...] = m_new

    # Finalize pooling and run the (batch-invariant) classifier tail exactly once.
    @pl.when(i == n_tiles - 1)
    def _finalize():
        pooled = acc_scr[...] * pl.reciprocal(l_scr[...])                # (1, H)
        h1 = jnp.maximum(
            jnp.dot(pooled, wd_ref[...], preferred_element_type=jnp.float32)
            + bd_ref[...], 0.0)
        logits = jnp.dot(h1, we_ref[...],
                         preferred_element_type=jnp.float32) + be_ref[...]
        logits_ref[...] = logits.astype(logits_ref.dtype)


def atten_mil_forward(x, params, *, n_tile=128):
    """Pallas AttenMIL.forward (eval / test path).

    Returns (logits, Y_prob, Y_hat, atten_score, results_dict) like PyTorch.
    """
    x = jnp.squeeze(x)
    d_in = params["w1_t"].shape[0]
    if x.shape[-1] != d_in:
        x = x.T
    n, d = x.shape
    h = params["w1_t"].shape[1]
    c = params["we_t"].shape[1]

    # Pad the instance axis up to a multiple of the tile; padded rows are
    # masked to NEG_BIG inside the kernel (never contribute to the pooling).
    n_pad = pl.cdiv(n, n_tile) * n_tile
    if n_pad != n:
        x = jnp.pad(x, ((0, n_pad - n), (0, 0)))
    n_tiles = n_pad // n_tile
    n_arr = jnp.array([n], dtype=jnp.int32)

    grid_spec = pltpu.PrefetchScalarGridSpec(
        num_scalar_prefetch=1,
        grid=(n_tiles,),
        in_specs=[
            pl.BlockSpec((n_tile, d), lambda i, n_ref: (i, 0)),   # x tile (streamed)
            pl.BlockSpec((d, h), lambda i, n_ref: (0, 0)),        # w1_t   (resident)
            pl.BlockSpec((1, h), lambda i, n_ref: (0, 0)),        # b1
            pl.BlockSpec((h, h), lambda i, n_ref: (0, 0)),        # wa_t
            pl.BlockSpec((1, h), lambda i, n_ref: (0, 0)),        # ba
            pl.BlockSpec((h, h), lambda i, n_ref: (0, 0)),        # wb_t
            pl.BlockSpec((1, h), lambda i, n_ref: (0, 0)),        # bb
            pl.BlockSpec((1, h), lambda i, n_ref: (0, 0)),        # wc_row
            pl.BlockSpec((1, 1), lambda i, n_ref: (0, 0)),        # bc
            pl.BlockSpec((h, h), lambda i, n_ref: (0, 0)),        # wd_t
            pl.BlockSpec((1, h), lambda i, n_ref: (0, 0)),        # bd
            pl.BlockSpec((h, c), lambda i, n_ref: (0, 0)),        # we_t
            pl.BlockSpec((1, c), lambda i, n_ref: (0, 0)),        # be
        ],
        out_specs=[
            pl.BlockSpec((1, n_tile), lambda i, n_ref: (0, i)),   # atten scores (lane-dense)
            pl.BlockSpec((1, c), lambda i, n_ref: (0, 0)),        # logits (resident)
        ],
        scratch_shapes=[
            pltpu.VMEM((1, 1), jnp.float32),   # running max m
            pltpu.VMEM((1, 1), jnp.float32),   # running denom l
            pltpu.VMEM((1, h), jnp.float32),   # running weighted-sum acc
        ],
    )

    scores_pad, logits = pl.pallas_call(
        _atten_mil_kernel,
        out_shape=(
            jax.ShapeDtypeStruct((1, n_pad), jnp.float32),
            jax.ShapeDtypeStruct((1, c), jnp.float32),
        ),
        grid_spec=grid_spec,
        # Single grid axis carries the online-softmax accumulator -> reduction.
        compiler_params=pltpu.CompilerParams(
            dimension_semantics=("arbitrary",)),
    )(n_arr, x, params["w1_t"], params["b1"], params["wa_t"], params["ba"],
      params["wb_t"], params["bb"], params["wc_row"], params["bc"],
      params["wd_t"], params["bd"], params["we_t"], params["be"])

    atten_score = scores_pad[:, :n]
    y_prob = jax.nn.softmax(logits, axis=1)
    y_hat = jnp.argmax(y_prob, axis=1)
    return logits, y_prob, y_hat, atten_score, {}


def _reference_forward(x, params):
    # Pure-JAX transcription of AttenMIL.forward (eval mode) for validation.
    x = jnp.squeeze(x)
    if x.shape[-1] != params["w1_t"].shape[0]:
        x = x.T
    h = jax.nn.relu(x @ params["w1_t"] + params["b1"])
    a = jnp.tanh(h @ params["wa_t"] + params["ba"])
    g = jax.nn.sigmoid(h @ params["wb_t"] + params["bb"])
    s = (a * g) @ params["wc_row"].T + params["bc"]      # (N, 1)
    atten_score = s.T                                     # (1, N)
    pooled = jax.nn.softmax(atten_score, axis=1) @ h      # (1, H)
    h1 = jax.nn.relu(pooled @ params["wd_t"] + params["bd"])
    logits = h1 @ params["we_t"] + params["be"]
    return logits, atten_score


if __name__ == "__main__":
    # Small but tile-exercising shapes: a bag of N=512 instances, 4 tiles of 128.
    N, input_dim, hidden, n_classes = 512, 128, 128, 2

    key = jax.random.PRNGKey(0)
    keys = jax.random.split(key, 13)

    def lin(kw, fan_in, shape):
        bound = 1.0 / math.sqrt(fan_in)
        return jax.random.uniform(kw, shape, minval=-bound, maxval=bound,
                                  dtype=jnp.float32)

    x = jax.random.normal(keys[0], (N, input_dim), dtype=jnp.float32)
    params = dict(
        w1_t=lin(keys[1], input_dim, (input_dim, hidden)),   # Linear weights pre-transposed
        b1=lin(keys[2], input_dim, (1, hidden)),
        wa_t=lin(keys[3], hidden, (hidden, hidden)),
        ba=lin(keys[4], hidden, (1, hidden)),
        wb_t=lin(keys[5], hidden, (hidden, hidden)),
        bb=lin(keys[6], hidden, (1, hidden)),
        wc_row=lin(keys[7], hidden, (1, hidden)),             # attention_c weight, row layout
        bc=lin(keys[8], hidden, (1, 1)),
        wd_t=lin(keys[9], hidden, (hidden, hidden)),
        bd=lin(keys[10], hidden, (1, hidden)),
        we_t=lin(keys[11], hidden, (hidden, n_classes)),
        be=lin(keys[12], hidden, (1, n_classes)),
    )

    logits, y_prob, y_hat, atten_score, _ = atten_mil_forward(x, params, n_tile=128)
    logits = jax.block_until_ready(logits)
    atten_score = jax.block_until_ready(atten_score)
    y_prob = jax.block_until_ready(y_prob)
    y_hat = jax.block_until_ready(y_hat)

    ref_logits, ref_atten = _reference_forward(x, params)
    ref_logits = jax.block_until_ready(ref_logits)

    assert logits.shape == (1, n_classes), logits.shape
    assert atten_score.shape == (1, N), atten_score.shape
    assert y_prob.shape == (1, n_classes) and y_hat.shape == (1,)
    assert jnp.allclose(atten_score, ref_atten, atol=1e-4, rtol=1e-4), \
        f"atten max abs err {jnp.max(jnp.abs(atten_score - ref_atten))}"
    assert jnp.allclose(logits, ref_logits, atol=1e-4, rtol=1e-4), \
        f"logits max abs err {jnp.max(jnp.abs(logits - ref_logits))}"

    print("KERNEL_OK")
</pallas_src>

<mosaic_0001>
module attributes {stable_mosaic.version = 11 : i64} {
  func.func @_atten_mil_kernel(%arg0: i32, %arg1: memref<1xi32, #tpu.memory_space<smem>>, %arg2: memref<128x128xf32, #tpu.memory_space<vmem>>, %arg3: memref<128x128xf32, #tpu.memory_space<vmem>>, %arg4: memref<1x128xf32, #tpu.memory_space<vmem>>, %arg5: memref<128x128xf32, #tpu.memory_space<vmem>>, %arg6: memref<1x128xf32, #tpu.memory_space<vmem>>, %arg7: memref<128x128xf32, #tpu.memory_space<vmem>>, %arg8: memref<1x128xf32, #tpu.memory_space<vmem>>, %arg9: memref<1x128xf32, #tpu.memory_space<vmem>>, %arg10: memref<1x1xf32, #tpu.memory_space<vmem>>, %arg11: memref<128x128xf32, #tpu.memory_space<vmem>>, %arg12: memref<1x128xf32, #tpu.memory_space<vmem>>, %arg13: memref<128x2xf32, #tpu.memory_space<vmem>>, %arg14: memref<1x2xf32, #tpu.memory_space<vmem>>, %arg15: memref<1x128xf32, #tpu.memory_space<vmem>>, %arg16: memref<1x2xf32, #tpu.memory_space<vmem>>, %arg17: memref<1x1xf32, #tpu.memory_space<vmem>>, %arg18: memref<1x1xf32, #tpu.memory_space<vmem>>, %arg19: memref<1x128xf32, #tpu.memory_space<vmem>>) attributes {dimension_semantics = [#tpu.dimension_semantics<arbitrary>], iteration_bounds = array<i64: 4>, scalar_prefetch = 1 : i64, scratch_operands = 3 : i64, tpu.core_type = #tpu.core_type<tc>, window_params = [{transform_indices = @transform_0, window_bounds = array<i64: 128, 128>}, {pipeline_mode = #tpu.pipeline_mode<synchronous>, transform_indices = @transform_1, window_bounds = array<i64: 128, 128>}, {pipeline_mode = #tpu.pipeline_mode<synchronous>, transform_indices = @transform_2, window_bounds = array<i64: 1, 128>}, {pipeline_mode = #tpu.pipeline_mode<synchronous>, transform_indices = @transform_3, window_bounds = array<i64: 128, 128>}, {pipeline_mode = #tpu.pipeline_mode<synchronous>, transform_indices = @transform_4, window_bounds = array<i64: 1, 128>}, {pipeline_mode = #tpu.pipeline_mode<synchronous>, transform_indices = @transform_5, window_bounds = array<i64: 128, 128>}, {pipeline_mode = #tpu.pipeline_mode<synchronous>, transform_indices = @transform_6, window_bounds = array<i64: 1, 128>}, {pipeline_mode = #tpu.pipeline_mode<synchronous>, transform_indices = @transform_7, window_bounds = array<i64: 1, 128>}, {pipeline_mode = #tpu.pipeline_mode<synchronous>, transform_indices = @transform_8, window_bounds = array<i64: 1, 1>}, {pipeline_mode = #tpu.pipeline_mode<synchronous>, transform_indices = @transform_9, window_bounds = array<i64: 128, 128>}, {pipeline_mode = #tpu.pipeline_mode<synchronous>, transform_indices = @transform_10, window_bounds = array<i64: 1, 128>}, {pipeline_mode = #tpu.pipeline_mode<synchronous>, transform_indices = @transform_11, window_bounds = array<i64: 128, 2>}, {pipeline_mode = #tpu.pipeline_mode<synchronous>, transform_indices = @transform_12, window_bounds = array<i64: 1, 2>}, {transform_indices = @transform_13, window_bounds = array<i64: 1, 128>}, {pipeline_mode = #tpu.pipeline_mode<synchronous>, transform_indices = @transform_14, window_bounds = array<i64: 1, 2>}]} {
    %c0_i32 = arith.constant 0 : i32
    %0 = arith.cmpi eq, %arg0, %c0_i32 : i32
    %1 = arith.extui %0 : i1 to i32
    %c0_i32_0 = arith.constant 0 : i32
    %2 = arith.cmpi ne, %1, %c0_i32_0 : i32
    scf.if %2 {
      %cst_43 = arith.constant -1.000000e+30 : f32
      %69 = vector.broadcast %cst_43 : f32 to vector<1x1xf32>
      %c0_44 = arith.constant 0 : index
      %c0_45 = arith.constant 0 : index
      %70 = vector.load %arg17[%c0_44, %c0_45] : memref<1x1xf32, #tpu.memory_space<vmem>>, vector<1x1xf32>
      tpu.vector_store %arg17[%c0_44, %c0_45], %69 {strides = array<i32>} : memref<1x1xf32, #tpu.memory_space<vmem>>, vector<1x1xf32>,
      %cst_46 = arith.constant 0.000000e+00 : f32
      %71 = vector.broadcast %cst_46 : f32 to vector<1x1xf32>
      %c0_47 = arith.constant 0 : index
      %c0_48 = arith.constant 0 : index
      %72 = vector.load %arg18[%c0_47, %c0_48] : memref<1x1xf32, #tpu.memory_space<vmem>>, vector<1x1xf32>
      tpu.vector_store %arg18[%c0_47, %c0_48], %71 {strides = array<i32>} : memref<1x1xf32, #tpu.memory_space<vmem>>, vector<1x1xf32>,
      %cst_49 = arith.constant 0.000000e+00 : f32
      %73 = vector.broadcast %cst_49 : f32 to vector<1x128xf32>
      %c0_50 = arith.constant 0 : index
      %c0_51 = arith.constant 0 : index
      %74 = vector.load %arg19[%c0_50, %c0_51] : memref<1x128xf32, #tpu.memory_space<vmem>>, vector<1x128xf32>
      tpu.vector_store %arg19[%c0_50, %c0_51], %73 {strides = array<i32>} : memref<1x128xf32, #tpu.memory_space<vmem>>, vector<1x128xf32>,
      %cst_52 = arith.constant 0.000000e+00 : f32
      %75 = vector.broadcast %cst_52 : f32 to vector<1x2xf32>
      %c0_53 = arith.constant 0 : index
      %c0_54 = arith.constant 0 : index
      %76 = vector.load %arg16[%c0_53, %c0_54] : memref<1x2xf32, #tpu.memory_space<vmem>>, vector<1x2xf32>
      tpu.vector_store %arg16[%c0_53, %c0_54], %75 {strides = array<i32>} : memref<1x2xf32, #tpu.memory_space<vmem>>, vector<1x2xf32>,
    } else {
    }
    %c0 = arith.constant 0 : index
    %c0_1 = arith.constant 0 : index
    %3 = vector.load %arg2[%c0, %c0_1] : memref<128x128xf32, #tpu.memory_space<vmem>>, vector<128x128xf32>
    %c0_2 = arith.constant 0 : index
    %c0_3 = arith.constant 0 : index
    %4 = vector.load %arg3[%c0_2, %c0_3] : memref<128x128xf32, #tpu.memory_space<vmem>>, vector<128x128xf32>
    %cst = arith.constant dense<0.000000e+00> : vector<128x128xf32>
    %5 = tpu.matmul %3, %4, %cst {dimension_numbers = #tpu.dot_dimension_numbers<[1], [0], [0], [1], [0, 0, 1, 1], [], []>} : vector<128x128xf32>, vector<128x128xf32>, vector<128x128xf32> -> vector<128x128xf32>
    %c0_4 = arith.constant 0 : index
    %c0_5 = arith.constant 0 : index
    %6 = vector.load %arg4[%c0_4, %c0_5] : memref<1x128xf32, #tpu.memory_space<vmem>>, vector<1x128xf32>
    %7 = vector.broadcast %6 : vector<1x128xf32> to vector<128x128xf32>
    %8 = arith.addf %5, %7 : vector<128x128xf32>
    %cst_6 = arith.constant 0.000000e+00 : f32
    %9 = vector.broadcast %cst_6 : f32 to vector<128x128xf32>
    %10 = arith.maximumf %8, %9 : vector<128x128xf32>
    %c0_7 = arith.constant 0 : index
    %c0_8 = arith.constant 0 : index
    %11 = vector.load %arg5[%c0_7, %c0_8] : memref<128x128xf32, #tpu.memory_space<vmem>>, vector<128x128xf32>
    %cst_9 = arith.constant dense<0.000000e+00> : vector<128x128xf32>
    %12 = tpu.matmul %10, %11, %cst_9 {dimension_numbers = #tpu.dot_dimension_numbers<[1], [0], [0], [1], [0, 0, 1, 1], [], []>} : vector<128x128xf32>, vector<128x128xf32>, vector<128x128xf32> -> vector<128x128xf32>
    %c0_10 = arith.constant 0 : index
    %c0_11 = arith.constant 0 : index
    %13 = vector.load %arg6[%c0_10, %c0_11] : memref<1x128xf32, #tpu.memory_space<vmem>>, vector<1x128xf32>
    %14 = vector.broadcast %13 : vector<1x128xf32> to vector<128x128xf32>
    %15 = arith.addf %12, %14 : vector<128x128xf32>
    %16 = math.tanh %15 : vector<128x128xf32>
    %c0_12 = arith.constant 0 : index
    %c0_13 = arith.constant 0 : index
    %17 = vector.load %arg7[%c0_12, %c0_13] : memref<128x128xf32, #tpu.memory_space<vmem>>, vector<128x128xf32>
    %cst_14 = arith.constant dense<0.000000e+00> : vector<128x128xf32>
    %18 = tpu.matmul %10, %17, %cst_14 {dimension_numbers = #tpu.dot_dimension_numbers<[1], [0], [0], [1], [0, 0, 1, 1], [], []>} : vector<128x128xf32>, vector<128x128xf32>, vector<128x128xf32> -> vector<128x128xf32>
    %c0_15 = arith.constant 0 : index
    %c0_16 = arith.constant 0 : index
    %19 = vector.load %arg8[%c0_15, %c0_16] : memref<1x128xf32, #tpu.memory_space<vmem>>, vector<1x128xf32>
    %20 = vector.broadcast %19 : vector<1x128xf32> to vector<128x128xf32>
    %21 = arith.addf %18, %20 : vector<128x128xf32>
    %22 = arith.negf %21 : vector<128x128xf32>
    %23 = math.exp %22 : vector<128x128xf32>
    %cst_17 = arith.constant 1.000000e+00 : f32
    %24 = vector.broadcast %cst_17 : f32 to vector<128x128xf32>
    %25 = arith.addf %24, %23 : vector<128x128xf32>
    %26 = arith.divf %24, %25 : vector<128x128xf32>
    %27 = arith.mulf %16, %26 : vector<128x128xf32>
    %28 = tpu.transpose %27, [1, 0] : vector<128x128xf32> -> vector<128x128xf32>
    %c0_18 = arith.constant 0 : index
    %c0_19 = arith.constant 0 : index
    %29 = vector.load %arg9[%c0_18, %c0_19] : memref<1x128xf32, #tpu.memory_space<vmem>>, vector<1x128xf32>
    %cst_20 = arith.constant dense<0.000000e+00> : vector<1x128xf32>
    %30 = tpu.matmul %29, %28, %cst_20 {dimension_numbers = #tpu.dot_dimension_numbers<[1], [0], [0], [1], [0, 0, 1, 1], [], []>} : vector<1x128xf32>, vector<128x128xf32>, vector<1x128xf32> -> vector<1x128xf32>
    %c0_21 = arith.constant 0 : index
    %c0_22 = arith.constant 0 : index
    %31 = vector.load %arg10[%c0_21, %c0_22] : memref<1x1xf32, #tpu.memory_space<vmem>>, vector<1x1xf32>
    %32 = vector.broadcast %31 : vector<1x1xf32> to vector<1x128xf32>
    %33 = arith.addf %30, %32 : vector<1x128xf32>
    %34 = tpu.iota {dimensions = array<i32: 1>} : vector<1x128xi32>
    %c128_i32 = arith.constant 128 : i32
    %35 = arith.muli %arg0, %c128_i32 : i32
    %36 = vector.broadcast %35 : i32 to vector<1x128xi32>
    %37 = arith.addi %34, %36 : vector<1x128xi32>
    %c0_23 = arith.constant 0 : index
    %38 = memref.load %arg1[%c0_23] : memref<1xi32, #tpu.memory_space<smem>>
    %39 = vector.broadcast %38 : i32 to vector<1x128xi32>
    %40 = arith.cmpi slt, %37, %39 : vector<1x128xi32>
    %cst_24 = arith.constant -1.000000e+30 : f32
    %41 = vector.broadcast %cst_24 : f32 to vector<1x128xf32>
    %42 = arith.select %40, %33, %41 : vector<1x128xi1>, vector<1x128xf32>
    %c0_25 = arith.constant 0 : index
    %c0_26 = arith.constant 0 : index
    %43 = vector.load %arg15[%c0_25, %c0_26] : memref<1x128xf32, #tpu.memory_space<vmem>>, vector<1x128xf32>
    tpu.vector_store %arg15[%c0_25, %c0_26], %42 {strides = array<i32>} : memref<1x128xf32, #tpu.memory_space<vmem>>, vector<1x128xf32>,
    %c0_27 = arith.constant 0 : index
    %c0_28 = arith.constant 0 : index
    %44 = vector.load %arg17[%c0_27, %c0_28] : memref<1x1xf32, #tpu.memory_space<vmem>>, vector<1x1xf32>
    %cst_29 = arith.constant dense<0xFF800000> : vector<1xf32>
    %45 = vector.multi_reduction <maximumf>, %42, %cst_29 [1] : vector<1x128xf32> to vector<1xf32>
    %46 = vector.shape_cast %45 : vector<1xf32> to vector<1x1xf32>
    %47 = arith.maximumf %44, %46 : vector<1x1xf32>
    %48 = arith.subf %44, %47 : vector<1x1xf32>
    %49 = math.exp %48 : vector<1x1xf32>
    %50 = vector.broadcast %47 : vector<1x1xf32> to vector<1x128xf32>
    %51 = arith.subf %42, %50 : vector<1x128xf32>
    %52 = math.exp %51 : vector<1x128xf32>
    %c0_30 = arith.constant 0 : index
    %c0_31 = arith.constant 0 : index
    %53 = vector.load %arg18[%c0_30, %c0_31] : memref<1x1xf32, #tpu.memory_space<vmem>>, vector<1x1xf32>
    %54 = arith.mulf %49, %53 : vector<1x1xf32>
    %cst_32 = arith.constant dense<0.000000e+00> : vector<1xf32>
    %55 = vector.multi_reduction <add>, %52, %cst_32 [1] : vector<1x128xf32> to vector<1xf32>
    %56 = vector.shape_cast %55 : vector<1xf32> to vector<1x1xf32>
    %57 = arith.addf %54, %56 : vector<1x1xf32>
    %c0_33 = arith.constant 0 : index
    %c0_34 = arith.constant 0 : index
    %58 = vector.load %arg18[%c0_33, %c0_34] : memref<1x1xf32, #tpu.memory_space<vmem>>, vector<1x1xf32>
    tpu.vector_store %arg18[%c0_33, %c0_34], %57 {strides = array<i32>} : memref<1x1xf32, #tpu.memory_space<vmem>>, vector<1x1xf32>,
    %c0_35 = arith.constant 0 : index
    %c0_36 = arith.constant 0 : index
    %59 = vector.load %arg19[%c0_35, %c0_36] : memref<1x128xf32, #tpu.memory_space<vmem>>, vector<1x128xf32>
    %60 = vector.broadcast %49 : vector<1x1xf32> to vector<1x128xf32>
    %61 = arith.mulf %60, %59 : vector<1x128xf32>
    %cst_37 = arith.constant dense<0.000000e+00> : vector<1x128xf32>
    %62 = tpu.matmul %52, %10, %cst_37 {dimension_numbers = #tpu.dot_dimension_numbers<[1], [0], [0], [1], [0, 0, 1, 1], [], []>} : vector<1x128xf32>, vector<128x128xf32>, vector<1x128xf32> -> vector<1x128xf32>
    %63 = arith.addf %61, %62 : vector<1x128xf32>
    %c0_38 = arith.constant 0 : index
    %c0_39 = arith.constant 0 : index
    %64 = vector.load %arg19[%c0_38, %c0_39] : memref<1x128xf32, #tpu.memory_space<vmem>>, vector<1x128xf32>
    tpu.vector_store %arg19[%c0_38, %c0_39], %63 {strides = array<i32>} : memref<1x128xf32, #tpu.memory_space<vmem>>, vector<1x128xf32>,
    %c0_40 = arith.constant 0 : index
    %c0_41 = arith.constant 0 : index
    %65 = vector.load %arg17[%c0_40, %c0_41] : memref<1x1xf32, #tpu.memory_space<vmem>>, vector<1x1xf32>
    tpu.vector_store %arg17[%c0_40, %c0_41], %47 {strides = array<i32>} : memref<1x1xf32, #tpu.memory_space<vmem>>, vector<1x1xf32>,
    %c3_i32 = arith.constant 3 : i32
    %66 = arith.cmpi eq, %arg0, %c3_i32 : i32
    %67 = arith.extui %66 : i1 to i32
    %c0_i32_42 = arith.constant 0 : i32
    %68 = arith.cmpi ne, %67, %c0_i32_42 : i32
    scf.if %68 {
      %c0_43 = arith.constant 0 : index
      %c0_44 = arith.constant 0 : index
      %69 = vector.load %arg19[%c0_43, %c0_44] : memref<1x128xf32, #tpu.memory_space<vmem>>, vector<1x128xf32>
      %c0_45 = arith.constant 0 : index
      %c0_46 = arith.constant 0 : index
      %70 = vector.load %arg18[%c0_45, %c0_46] : memref<1x1xf32, #tpu.memory_space<vmem>>, vector<1x1xf32>
      %71 = tpu.reciprocal %70 : vector<1x1xf32> -> vector<1x1xf32>
      %72 = vector.broadcast %71 : vector<1x1xf32> to vector<1x128xf32>
      %73 = arith.mulf %69, %72 : vector<1x128xf32>
      %c0_47 = arith.constant 0 : index
      %c0_48 = arith.constant 0 : index
      %74 = vector.load %arg11[%c0_47, %c0_48] : memref<128x128xf32, #tpu.memory_space<vmem>>, vector<128x128xf32>
      %cst_49 = arith.constant dense<0.000000e+00> : vector<1x128xf32>
      %75 = tpu.matmul %73, %74, %cst_49 {dimension_numbers = #tpu.dot_dimension_numbers<[1], [0], [0], [1], [0, 0, 1, 1], [], []>} : vector<1x128xf32>, vector<128x128xf32>, vector<1x128xf32> -> vector<1x128xf32>
      %c0_50 = arith.constant 0 : index
      %c0_51 = arith.constant 0 : index
      %76 = vector.load %arg12[%c0_50, %c0_51] : memref<1x128xf32, #tpu.memory_space<vmem>>, vector<1x128xf32>
      %77 = arith.addf %75, %76 : vector<1x128xf32>
      %cst_52 = arith.constant 0.000000e+00 : f32
      %78 = vector.broadcast %cst_52 : f32 to vector<1x128xf32>
      %79 = arith.maximumf %77, %78 : vector<1x128xf32>
      %c0_53 = arith.constant 0 : index
      %c0_54 = arith.constant 0 : index
      %80 = vector.load %arg13[%c0_53, %c0_54] : memref<128x2xf32, #tpu.memory_space<vmem>>, vector<128x2xf32>
      %cst_55 = arith.constant dense<0.000000e+00> : vector<1x2xf32>
      %81 = tpu.matmul %79, %80, %cst_55 {dimension_numbers = #tpu.dot_dimension_numbers<[1], [0], [0], [1], [0, 0, 1, 1], [], []>} : vector<1x128xf32>, vector<128x2xf32>, vector<1x2xf32> -> vector<1x2xf32>
      %c0_56 = arith.constant 0 : index
      %c0_57 = arith.constant 0 : index
      %82 = vector.load %arg14[%c0_56, %c0_57] : memref<1x2xf32, #tpu.memory_space<vmem>>, vector<1x2xf32>
      %83 = arith.addf %81, %82 : vector<1x2xf32>
      %c0_58 = arith.constant 0 : index
      %c0_59 = arith.constant 0 : index
      %84 = vector.load %arg16[%c0_58, %c0_59] : memref<1x2xf32, #tpu.memory_space<vmem>>, vector<1x2xf32>
      tpu.vector_store %arg16[%c0_58, %c0_59], %83 {strides = array<i32>} : memref<1x2xf32, #tpu.memory_space<vmem>>, vector<1x2xf32>,
    } else {
    }
    return
  }
  func.func @transform_0(%arg0: i32, %arg1: memref<1xi32, #tpu.memory_space<smem>>) -> (i32, i32) {
    %c0_i32 = arith.constant 0 : i32
    %c0_i32_0 = arith.constant 0 : i32
    return %arg0, %c0_i32 : i32, i32
  }
  func.func @transform_1(%arg0: i32, %arg1: memref<1xi32, #tpu.memory_space<smem>>) -> (i32, i32) {
    %c0_i32 = arith.constant 0 : i32
    %c0_i32_0 = arith.constant 0 : i32
    %c0_i32_1 = arith.constant 0 : i32
    return %c0_i32, %c0_i32_0 : i32, i32
  }
  func.func @transform_2(%arg0: i32, %arg1: memref<1xi32, #tpu.memory_space<smem>>) -> (i32, i32) {
    %c0_i32 = arith.constant 0 : i32
    %c0_i32_0 = arith.constant 0 : i32
    %c0_i32_1 = arith.constant 0 : i32
    return %c0_i32, %c0_i32_0 : i32, i32
  }
  func.func @transform_3(%arg0: i32, %arg1: memref<1xi32, #tpu.memory_space<smem>>) -> (i32, i32) {
    %c0_i32 = arith.constant 0 : i32
    %c0_i32_0 = arith.constant 0 : i32
    %c0_i32_1 = arith.constant 0 : i32
    return %c0_i32, %c0_i32_0 : i32, i32
  }
  func.func @transform_4(%arg0: i32, %arg1: memref<1xi32, #tpu.memory_space<smem>>) -> (i32, i32) {
    %c0_i32 = arith.constant 0 : i32
    %c0_i32_0 = arith.constant 0 : i32
    %c0_i32_1 = arith.constant 0 : i32
    return %c0_i32, %c0_i32_0 : i32, i32
  }
  func.func @transform_5(%arg0: i32, %arg1: memref<1xi32, #tpu.memory_space<smem>>) -> (i32, i32) {
    %c0_i32 = arith.constant 0 : i32
    %c0_i32_0 = arith.constant 0 : i32
    %c0_i32_1 = arith.constant 0 : i32
    return %c0_i32, %c0_i32_0 : i32, i32
  }
  func.func @transform_6(%arg0: i32, %arg1: memref<1xi32, #tpu.memory_space<smem>>) -> (i32, i32) {
    %c0_i32 = arith.constant 0 : i32
    %c0_i32_0 = arith.constant 0 : i32
    %c0_i32_1 = arith.constant 0 : i32
    return %c0_i32, %c0_i32_0 : i32, i32
  }
  func.func @transform_7(%arg0: i32, %arg1: memref<1xi32, #tpu.memory_space<smem>>) -> (i32, i32) {
    %c0_i32 = arith.constant 0 : i32
    %c0_i32_0 = arith.constant 0 : i32
    %c0_i32_1 = arith.constant 0 : i32
    return %c0_i32, %c0_i32_0 : i32, i32
  }
  func.func @transform_8(%arg0: i32, %arg1: memref<1xi32, #tpu.memory_space<smem>>) -> (i32, i32) {
    %c0_i32 = arith.constant 0 : i32
    %c0_i32_0 = arith.constant 0 : i32
    %c0_i32_1 = arith.constant 0 : i32
    return %c0_i32, %c0_i32_0 : i32, i32
  }
  func.func @transform_9(%arg0: i32, %arg1: memref<1xi32, #tpu.memory_space<smem>>) -> (i32, i32) {
    %c0_i32 = arith.constant 0 : i32
    %c0_i32_0 = arith.constant 0 : i32
    %c0_i32_1 = arith.constant 0 : i32
    return %c0_i32, %c0_i32_0 : i32, i32
  }
  func.func @transform_10(%arg0: i32, %arg1: memref<1xi32, #tpu.memory_space<smem>>) -> (i32, i32) {
    %c0_i32 = arith.constant 0 : i32
    %c0_i32_0 = arith.constant 0 : i32
    %c0_i32_1 = arith.constant 0 : i32
    return %c0_i32, %c0_i32_0 : i32, i32
  }
  func.func @transform_11(%arg0: i32, %arg1: memref<1xi32, #tpu.memory_space<smem>>) -> (i32, i32) {
    %c0_i32 = arith.constant 0 : i32
    %c0_i32_0 = arith.constant 0 : i32
    %c0_i32_1 = arith.constant 0 : i32
    return %c0_i32, %c0_i32_0 : i32, i32
  }
  func.func @transform_12(%arg0: i32, %arg1: memref<1xi32, #tpu.memory_space<smem>>) -> (i32, i32) {
    %c0_i32 = arith.constant 0 : i32
    %c0_i32_0 = arith.constant 0 : i32
    %c0_i32_1 = arith.constant 0 : i32
    return %c0_i32, %c0_i32_0 : i32, i32
  }
  func.func @transform_13(%arg0: i32, %arg1: memref<1xi32, #tpu.memory_space<smem>>) -> (i32, i32) {
    %c0_i32 = arith.constant 0 : i32
    %c0_i32_0 = arith.constant 0 : i32
    return %c0_i32, %arg0 : i32, i32
  }
  func.func @transform_14(%arg0: i32, %arg1: memref<1xi32, #tpu.memory_space<smem>>) -> (i32, i32) {
    %c0_i32 = arith.constant 0 : i32
    %c0_i32_0 = arith.constant 0 : i32
    %c0_i32_1 = arith.constant 0 : i32
    return %c0_i32, %c0_i32_0 : i32, i32
  }
}

</mosaic_0001>

<bundles_post_ra>
// kernel: tpu_custom_call.1
= control target key start
LH: loop header
LB: loop body
LE: loop exit
PB: predicated region body
PF: predicated region fallthrough
CT: control target
= control target key end

     0   :  { %s3523_s0 = inlined_call_operand.<no memory space> [shape: s32[1], index: 0, kind: input, shape index: {}]   ;;  %s3524_s1 = inlined_call_operand.hbm [shape: f32[512,128], index: 1, kind: input, shape index: {}]   ;;  %s3525_s2 = inlined_call_operand.vmem [shape: f32[128,128], index: 2, kind: input, shape index: {}]   ;;  %s3526_s3 = inlined_call_operand.vmem [shape: f32[1,128], index: 3, kind: input, shape index: {}]   ;;  %s3527_s4 = inlined_call_operand.hbm [shape: f32[128,128], index: 4, kind: input, shape index: {}]   ;;  %s3528_s5 = inlined_call_operand.vmem [shape: f32[1,128], index: 5, kind: input, shape index: {}]   ;;  %s3529_s6 = inlined_call_operand.hbm [shape: f32[128,128], index: 6, kind: input, shape index: {}]   ;;  %s3530_s7 = inlined_call_operand.vmem [shape: f32[1,128], index: 7, kind: input, shape index: {}]   ;;  %s3531_s8 = inlined_call_operand.vmem [shape: f32[1,128], index: 8, kind: input, shape index: {}]   ;;  %s3532_s9 = inlined_call_operand.<no memory space> [shape: f32[1,1], index: 9, kind: input, shape index: {}]   ;;  %s3533_s10 = inlined_call_operand.hbm [shape: f32[128,128], index: 10, kind: input, shape index: {}]   ;;  %s3534_s11 = inlined_call_operand.vmem [shape: f32[1,128], index: 11, kind: input, shape index: {}]   ;;  %s3535_s12 = inlined_call_operand.vmem [shape: f32[128,2], index: 12, kind: input, shape index: {}]   ;;  %s3536_s13 = inlined_call_operand.vmem [shape: f32[1,2], index: 13, kind: input, shape index: {}]   ;;  %s3537_s14 = inlined_call_operand.hbm [shape: f32[1,512], index: 14, kind: output, shape index: {0}]   ;;  %s3538_s15 = inlined_call_operand.hbm [shape: f32[1,2], index: 15, kind: output, shape index: {1}]  }
   0x1   :  { %3547 = sst [smem:[#allocation26_spill]] %s3534_s11  ;;  %v22_v0 = vstv %s3532_s9 }
   0x2   :  { %3548 = sst [smem:[#allocation27_spill]] %s3535_s12  ;;  %23 = vst [vmem:[#allocation7] sm:$0x1] %v22_v0 }
   0x3   :  { %3549 = sst [smem:[#allocation28_spill]] %s3536_s13 }
   0x4   :  { %3550 = sst [smem:[#allocation29_spill]] %s3537_s14 }
   0x5   :  { %3551 = sst [smem:[#allocation30_spill]] %s3538_s15 }
   0x6   :  { %21 = sst [smem:[#allocation6]] %s3523_s0 }
   0x7   :  { %24 = vsyncpa [#allocation9], 0 }
   0x8   :  { %26 = vsyncpa [#allocation9 + $0x1], 0 }
   0x9   :  { %27 = vsyncpa [#allocation12], 0 }
   0xa   :  { %28 = vsyncpa [#allocation15], 0 }
   0xb   :  { %29 = vsyncpa [#allocation10], 0 }
   0xc   :  { %31 = vsyncpa [#allocation10 + $0x1], 0 }
   0xd   :  { %32 = vsyncpa [#allocation18], 0  ;;  %s2966_s22 = smov 0   ;;  %s2968_s23 = smov 0  }
   0xe   :  { %s2970_s24 = smov 0   ;;  %s2972_s25 = smov 0  }
   0xf LB: > { %3552 = sst [smem:[#allocation24_spill]] %s2848_s22  ;;  %s2987_s0 = sadd.s32 4294967295, %s2860_s25   ;;  %s2860_s25 = sphi %s2972_s25, %s3585_s25   ;;  %s2856_s24 = sphi %s2970_s24, %s3584_s24   ;;  %s2852_s23 = sphi %s2968_s23, %s3583_s23   ;;  %s2848_s22 = sphi %s2966_s22, %s3582_s22  }
  0x10   : > { %s1735_s9 = sadd.s32 4294967294, %s2860_s25   ;;  %p58_p0 = scmp.ne.s32.totalorder %s2852_s23, %s2848_s22 }
  0x11   : > { %p3542_p1 = scmp.eq.s32.totalorder %s2987_s0, 0  ;;  %p340_p3 = scmp.eq.s32.totalorder %s1735_s9, 3 }
  0x12   : > { %p1736_p5 = scmp.ge.s32.totalorder %s2860_s25, 1  ;;  %p368_p7 = scmp.lt.s32.totalorder %s2860_s25, 5 }
  0x13   : > { %p2996_p4 = por %p3542_p1, %p58_p0  ;;  %p3001_p6 = por %p340_p3, %p58_p0 }
  0x14   : > { %p3007_p9 = pnand %p1736_p5, %p368_p7  ;;  %s2862_s29 = smov [#allocation11]  }
  0x15   : > { %s3553_s26 = scalar_select %p2996_p4, 1, 0 }
  0x16   : > { %s3554_s27 = scalar_select %p3001_p6, 1, 0 }
  0x17   : > { %s3556_s28 = scalar_select %p3007_p9, 1, 0 }
  0x18   : > { %3555 = sst [smem:[#allocation25_spill]] %s3554_s27  ;;  %s386_s30 = sshll.u32 %s2862_s29, 4  ;;  %s3011_s30 = int_to_ptr.vmem [resolvable:$true] %s386_s30 }
  0x19   : > { %p2461_p10 = pneg %p3007_p9  ;;  %s2863_s17 = smov [#allocation13]  }
  0x1a   : > { %s402_s18 = sshll.u32 %s2863_s17, 4  ;;  %s2864_s19 = smov [#allocation14]   ;;  %s3021_s18 = int_to_ptr.vmem [resolvable:$true] %s402_s18 }
  0x1b   : > { %p3017_p11 = pnand %p2461_p10, %p3542_p1  ;;  %s3023_s20 = sshll.u32 %s2864_s19, 4  ;;  %s425_s20 = int_to_ptr.vmem [resolvable:$true] %s3023_s20 }
  0x1c   : > { %s2642_s29 = scalar_lea.hbm %s3527_s4, 2048 }
  0x1d   : > { %p2643_p12 = scmp.ne.s32.totalorder %s3527_s4, %s2642_s29  ;;  %p3033_p13 = pneg %p3017_p11 }
  0x1e   : > { %p2649_p5 = scmp.lt.u32.totalorder %s2642_s29, %s3527_s4 }
  0x1f   : > { %p2645_p0 = pnand %p3033_p13, %p2643_p12 }
  0x21   : > { %p2646_p3 = pneg %p2645_p0 }
  0x23   : > { %p2651_p7 = pnand %p2649_p5, %p2646_p3 }
  0x25   : > { %2654 = shalt.err (!%p2651_p7)
}
  0x26   : > { %s2655_s22 = scalar_lea.vmem %s3011_s30, 2048  ;;  %p2663_p2 = scmp.lt.s32.totalorder %s3011_s30, %s3011_s30 }
  0x27   : > { %p2656_p10 = scmp.ne.s32.totalorder %s3011_s30, %s2655_s22  ;;  %p2664_p6 = scmp.lt.s32.totalorder %s2655_s22, %s2655_s22 }
  0x29   : > { %p2658_p8 = pnand %p2656_p10, %p3033_p13  ;;  %p2665_p12 = por %p2664_p6, %p2663_p2 }
  0x2b   : > { %p2659_p1 = pneg %p2658_p8 }
  0x2d   : > { %p2666_p0 = pnand %p2665_p12, %p2659_p1 }
  0x2f   : > { %2669 = shalt.err (!%p2666_p0)
}
  0x30   : > { %s2865_s27 = smov 128   ;;  %s2866_s21 = smov 8  }
  0x31   : > { %2464 = dma.hbm_to_vmem [thread:$0]  (!%p3017_p11), %s3527_s4, 2048, %s3011_s30, [#allocation12], %s2865_s27, %s2865_s27, %s2866_s21  }
  0x32   : > { %s2670_s22 = scalar_lea.hbm %s3529_s6, 2048 }
  0x33   : > { %p2671_p1 = scmp.ne.s32.totalorder %s3529_s6, %s2670_s22  ;;  %p2677_p8 = scmp.lt.u32.totalorder %s2670_s22, %s3529_s6 }
  0x35   : > { %p2673_p2 = pnand %p2671_p1, %p3033_p13 }
  0x37   : > { %p2674_p6 = pneg %p2673_p2 }
  0x39   : > { %p2679_p3 = pnand %p2677_p8, %p2674_p6 }
  0x3b   : > { %2682 = shalt.err (!%p2679_p3)
}
  0x3c   : > { %s2683_s30 = scalar_lea.vmem %s3021_s18, 2048  ;;  %p2691_p12 = scmp.lt.s32.totalorder %s3021_s18, %s3021_s18 }
  0x3d   : > { %p2684_p5 = scmp.ne.s32.totalorder %s3021_s18, %s2683_s30  ;;  %p2692_p0 = scmp.lt.s32.totalorder %s2683_s30, %s2683_s30 }
  0x3f   : > { %p2686_p7 = pnand %p2684_p5, %p3033_p13  ;;  %p2693_p1 = por %p2692_p0, %p2691_p12 }
  0x41   : > { %p2687_p10 = pneg %p2686_p7 }
  0x43   : > { %p2694_p2 = pnand %p2693_p1, %p2687_p10 }
  0x45   : > { %2697 = shalt.err (!%p2694_p2)
}
  0x46   : > { %2467 = dma.hbm_to_vmem [thread:$0]  (!%p3017_p11), %s3529_s6, 2048, %s3021_s18, [#allocation12], %s2865_s27, %s2865_s27, %s2866_s21  }
  0x47   : > { %s2698_s9 = scalar_lea.hbm %s3533_s10, 2048 }
  0x48   : > { %p2699_p6 = scmp.ne.s32.totalorder %s3533_s10, %s2698_s9  ;;  %p2705_p5 = scmp.lt.u32.totalorder %s2698_s9, %s3533_s10 }
  0x4a   : > { %p2701_p8 = pnand %p2699_p6, %p3033_p13 }
  0x4c   : > { %p2702_p3 = pneg %p2701_p8 }
  0x4e   : > { %p2707_p7 = pnand %p2705_p5, %p2702_p3 }
  0x50   : > { %2710 = shalt.err (!%p2707_p7)
}
  0x51   : > { %s2711_s30 = scalar_lea.vmem %s425_s20, 2048  ;;  %p2719_p1 = scmp.lt.s32.totalorder %s425_s20, %s425_s20 }
  0x52   : > { %p2712_p10 = scmp.ne.s32.totalorder %s425_s20, %s2711_s30  ;;  %p2720_p2 = scmp.lt.s32.totalorder %s2711_s30, %s2711_s30 }
  0x54   : > { %p2714_p12 = pnand %p2712_p10, %p3033_p13  ;;  %p2721_p4 = por %p2720_p2, %p2719_p1 }
  0x56   : > { %p2715_p0 = pneg %p2714_p12 }
  0x58   : > { %p2722_p9 = pnand %p2721_p4, %p2715_p0 }
  0x5a   : > { %2725 = shalt.err (!%p2722_p9)
}
  0x5b   : > { %2470 = dma.hbm_to_vmem [thread:$0]  (!%p3017_p11), %s3533_s10, 2048, %s425_s20, [#allocation15], %s2865_s27, %s2865_s27, %s2866_s21  }
  0x5c   : > { %s3106_s15 = sadd.s32 1, %s2860_s25   ;;  %s45_s12 = sadd.s32 1, %s2856_s24 }
  0x5d   : > { %s42_s16 = ssub.s32 %s2860_s25, %s3106_s15  ;;  %p52_p9 = scmp.ne.s32.totalorder %s2856_s24, %s2852_s23 }
  0x5e   : > { %p43_p4 = scmp.eq.s32.totalorder %s42_s16, 0  ;;  %p53_p13 = scmp.eq.s32.totalorder %s2860_s25, 0 }
  0x5f   : > { %p2482_p6 = scmp.lt.s32.totalorder %s2860_s25, 4  ;;  %p3559_p3 = scmp.eq.s32.totalorder %s2987_s0, 3 }
  0x60   : > { %s3116_s13 = scalar_select %p43_p4, %s2856_s24, %s45_s12  }
  0x61   : > { %p54_p8 = por %p53_p13, %p52_p9  ;;  %p3120_p5 = por %p3559_p3, %p52_p9 }
  0x62   : > { %s447_s9 = sand.u32 1, %s2856_s24   ;;  %s1776_s29 = sshll.u32 %s2860_s25, 11 }
  0x63   : > { %s1741_s20 = sshll.u32 %s447_s9, 7  ;;  %s3129_s22 = scalar_lea.hbm %s3524_s1, %s1776_s29 }
  0x64   : > { %s451_s30 = scalar_lea.vmem [#allocation8], %s1741_s20  ;;  %p3131_p11 = pnand %p2482_p6, %p54_p8 }
  0x65   : > { %s458_s18 = sshll.u32 %s451_s30, 4  ;;  %s3137_s16 = scalar_lea.sflag [#allocation9], %s447_s9  ;;  %s3135_s18 = int_to_ptr.vmem [resolvable:$true] %s458_s18 }
  0x66   : > { %s2726_s12 = scalar_lea.hbm %s3129_s22, 2048  ;;  %p2728_p10 = pneg %p3131_p11 }
  0x67   : > { %p2727_p7 = scmp.ne.s32.totalorder %s3129_s22, %s2726_s12  ;;  %s2731_s17 = scalar_lea.hbm %s3524_s1, 8192 }
  0x68   : > { %p2732_p1 = scmp.lt.u32.totalorder %s3129_s22, %s3524_s1  ;;  %p2733_p2 = scmp.lt.u32.totalorder %s2731_s17, %s2726_s12 }
  0x69   : > { %p2729_p12 = pnand %p2728_p10, %p2727_p7  ;;  %p2735_p9 = scmp.lt.u32.totalorder %s2726_s12, %s3129_s22 }
  0x6a   : > { %p2734_p4 = por %p2733_p2, %p2732_p1 }
  0x6b   : > { %p2730_p0 = pneg %p2729_p12 }
  0x6c   : > { %p2736_p13 = por %p2735_p9, %p2734_p4 }
  0x6e   : > { %p2737_p6 = pnand %p2736_p13, %p2730_p0 }
  0x70   : > { %2740 = shalt.err (!%p2737_p6)
}
  0x71   : > { %s2741_s9 = scalar_lea.vmem %s3135_s18, 2048  ;;  %s2867_s29 = smov [#allocation8]  }
  0x72   : > { %p2742_p8 = scmp.ne.s32.totalorder %s3135_s18, %s2741_s9  ;;  %s2746_s20 = sshll.u32 %s2867_s29, 4  ;;  %s2747_s20 = int_to_ptr.vmem [resolvable:$false] %s2746_s20 }
  0x73   : > { %s2748_s19 = scalar_lea.vmem %s2747_s20, 4096  ;;  %p2749_p12 = scmp.lt.s32.totalorder %s3135_s18, %s2747_s20 }
  0x74   : > { %p2744_p3 = pnand %p2742_p8, %p2728_p10  ;;  %p2750_p1 = scmp.lt.s32.totalorder %s2748_s19, %s2741_s9 }
  0x76   : > { %p2745_p7 = pneg %p2744_p3  ;;  %p2751_p2 = por %p2750_p1, %p2749_p12 }
  0x78   : > { %p2752_p4 = pnand %p2751_p2, %p2745_p7 }
  0x7a   : > { %2755 = shalt.err (!%p2752_p4)
}
  0x7b   : > { %2474 = dma.hbm_to_vmem [thread:$0]  (!%p3131_p11), %s3129_s22, 2048, %s3135_s18, %s3137_s16, %s2865_s27, %s2865_s27, %s2866_s21  }
  0x7c   : > { %p3562_p10 = scmp.ne.s32.totalorder %s3556_s28, 0 }
  0x7d   : > { %s3171_s12 = sand.u32 (!%p3562_p10), 1, %s2852_s23   ;;  %p3563_p0 = scmp.ne.s32.totalorder (!%p3562_p10), %s3553_s26, 0 }
  0x7e   : > { %470 = sbr.rel (%p3562_p10) target bundleno = 2003 (0x7d3), region = 72  ;;  %s1745_s17 = sshll.u32 (!%p3562_p10), %s3171_s12, 7 }
  0x7f   : > { %s473_s30 = scalar_lea.sflag (!%p3562_p10), [#allocation9], %s3171_s12  ;;  %s3175_s9 = scalar_lea.vmem (!%p3562_p10), [#allocation8], %s1745_s17 }
  0x85   : > { %2827 = dma.done.wait (%p3563_p0), %s473_s30, 2048  }
  0x86   : > { %2829 = vsyncadd (%p3563_p0), %s473_s30, 4294965248  ;;  %p3564_p11 = scmp.eq.s32.totalorder %s2987_s0, 0 }
  0x88   : > { %2831 = dma.done.wait (%p3564_p11), [#allocation12], 4096   ;;  %p3565_p9 = pmov %p3564_p11 }
  0x8a   : > { %2833 = vsyncadd (%p3565_p9), [#allocation12], 4294963200  ;;  %p3566_p13 = pmov %p3565_p9 }
  0x8b   : > { %p3567_p6 = pmov %p3565_p9 }
  0x8c   : > { %2835 = dma.done.wait (%p3566_p13), [#allocation15], 2048  }
  0x8d   : > { %2837 = vsyncadd (%p3567_p6), [#allocation15], 4294965248  ;;  %s529_s28 = scalar_lea.vmem [#allocation16], %s3171_s12  ;;  %p3568_p8 = scmp.ne.s32.totalorder %s2987_s0, 0 }
  0x8e   : > { %vm537_vm0 = vcmask (!%p3568_p8), 0   ;;  %vm541_vm1 = vcmask (!%p3568_p8), 8192   ;;  %v2868_v1 = vmov (!%p3568_p8), -1e+30   ;;  %v2869_v2 = vmov (!%p3568_p8), 0.0  }
  0x8f   : > { %536 = sbr.rel (%p3568_p8) target bundleno = 150 (0x96), region = 92  ;;  %538 = vst.msk [vmem:[#allocation2] sm:$0x1] (!%p3568_p8), %vm537_vm0, %v2868_v1  ;;  %539 = vst.msk [vmem:[#allocation3] sm:$0x1] (!%p3568_p8), %vm537_vm0, %v2869_v2 }
  0x90   : > { %540 = vst [vmem:[#allocation4] sm:$0x1] (!%p3568_p8), %v2869_v2  ;;  %542 = vst.msk [vmem:[#allocation17] sm:$0x1] (!%p3568_p8), %vm541_vm1, %v2869_v2 }
  0x96 PF: > { %v559_v3 = vld [vmem:[%s3525_s2] sm:$0xff]  ;;  %v560_v4 = vld [vmem:[%s3525_s2 + $0x8] sm:$0xff]  ;;  %v561_v5 = vld [vmem:[%s3525_s2 + $0x10] sm:$0xff]  ;;  %vm2871_vm2 = vmmov 0   ;;  %s1293_s22 = sld [smem:[#allocation6]]  ;;  %s1769_s18 = sshll.u32 %s2987_s0, 7 }
  0x97   : > { %v2249_v6 = vpack.c.bf16 %v560_v4, %v559_v3  ;;  %v562_v7 = vld [vmem:[%s3525_s2 + $0x18] sm:$0xff]  ;;  %v563_v9 = vld [vmem:[%s3525_s2 + $0x20] sm:$0xff]  ;;  %v564_v10 = vld [vmem:[%s3525_s2 + $0x28] sm:$0xff]  ;;  %vm1299_vm4 = vcmask 1040384   ;;  %vm1325_vm5 = vcmask 0   ;;  %p1770_p3 = scmp.ne.s32.totalorder %s2987_s0, 3 }
  0x98   : > { %v2253_v8 = vpack.c.bf16 %v562_v7, %v561_v5  ;;  %v2257_v11 = vpack.c.bf16 %v564_v10, %v563_v9  ;;  %v543_v12 = vld [vmem:[%s3175_s9] sm:$0xff]  ;;  %v565_v13 = vld [vmem:[%s3525_s2 + $0x30] sm:$0xff]  ;;  %v566_v14 = vld [vmem:[%s3525_s2 + $0x38] sm:$0xff]  ;;  %vm2876_vm6 = vmmov (!%p1770_p3), 0   ;;  %s3569_s29 = sld [smem:[#allocation27_spill]] (!%p1770_p3)  ;;  %s3571_s16 = sld [smem:[#allocation28_spill]] (!%p1770_p3) }
  0x99   : > { %2250 = vmatprep.subr.bf16.mxu0 %v2249_v6  ;;  %1973 = vmatprep.mubr.f32.mxu0 %v543_v12  ;;  %v2261_v15 = vpack.c.bf16 %v566_v14, %v565_v13  ;;  %v567_v16 = vld [vmem:[%s3525_s2 + $0x40] sm:$0xff]  ;;  %v568_v17 = vld [vmem:[%s3525_s2 + $0x48] sm:$0xff]  ;;  %v745_v21 = vld [vmem:[#allocation11 + $0x10] sm:$0xff]  ;;  %vm1603_vm7 = vcmask (!%p1770_p3), 8192  }
  0x9a   : > { %2252 = vmatpush3.bf16.msra.mxu0 %v2249_v6  ;;  %v743_v18 = vld [vmem:[#allocation11] sm:$0xff]  ;;  %v744_v19 = vld [vmem:[#allocation11 + $0x8] sm:$0xff]  ;;  %v2265_v22 = vpack.c.bf16 %v568_v17, %v567_v16  ;;  %v746_v24 = vld [vmem:[#allocation11 + $0x18] sm:$0xff] }
  0x9b   : > { %2254 = vmatprep.subr.bf16.mxu0 %v2253_v8  ;;  %v2281_v20 = vpack.c.bf16 %v744_v19, %v743_v18  ;;  %v569_v23 = vld [vmem:[%s3525_s2 + $0x50] sm:$0xff]  ;;  %v570_v25 = vld [vmem:[%s3525_s2 + $0x58] sm:$0xff]  ;;  %v2285_v26 = vpack.c.bf16 %v746_v24, %v745_v21  ;;  %v747_v27 = vld [vmem:[#allocation11 + $0x20] sm:$0xff] }
  0x9c   : > { %v748_v28 = vld [vmem:[#allocation11 + $0x28] sm:$0xff]  ;;  %v2269_v30 = vpack.c.bf16 %v570_v25, %v569_v23  ;;  %v749_v31 = vld [vmem:[#allocation11 + $0x30] sm:$0xff]  ;;  %v750_v32 = vld [vmem:[#allocation11 + $0x38] sm:$0xff] }
  0x9d   : > { %2282 = vmatprep.subr.bf16.mxu1 %v2281_v20  ;;  %v2289_v29 = vpack.c.bf16 %v748_v28, %v747_v27  ;;  %v571_v33 = vld [vmem:[%s3525_s2 + $0x60] sm:$0xff]  ;;  %v572_v34 = vld [vmem:[%s3525_s2 + $0x68] sm:$0xff]  ;;  %v2293_v35 = vpack.c.bf16 %v750_v32, %v749_v31  ;;  %v573_v39 = vld [vmem:[%s3525_s2 + $0x70] sm:$0xff]  ;;  %v2870_v27 = vmov 0.0|0.0  }
  0x9e   : > { %2256 = vmatpush3.bf16.msra.mxu0 %v2253_v8  ;;  %2284 = vmatpush3.bf16.msra.mxu1 %v2281_v20  ;;  %v2273_v36 = vpack.c.bf16 %v572_v34, %v571_v33  ;;  %v751_v37 = vld [vmem:[#allocation11 + $0x40] sm:$0xff]  ;;  %v752_v38 = vld [vmem:[#allocation11 + $0x48] sm:$0xff]  ;;  %v574_v40 = vld [vmem:[%s3525_s2 + $0x78] sm:$0xff] }
  0x9f   : > { %2258 = vmatprep.subr.bf16.mxu0 %v2257_v11  ;;  %2286 = vmatprep.subr.bf16.mxu1 %v2285_v26  ;;  %v2297_v41 = vpack.c.bf16 %v752_v38, %v751_v37  ;;  %v2277_v42 = vpack.c.bf16 %v574_v40, %v573_v39  ;;  %v753_v43 = vld [vmem:[#allocation11 + $0x50] sm:$0xff]  ;;  %v754_v44 = vld [vmem:[#allocation11 + $0x58] sm:$0xff]  ;;  %v927_v45 = vld [vmem:[#allocation13] sm:$0xff] }
  0xa0   : > { %v928_v46 = vld [vmem:[#allocation13 + $0x8] sm:$0xff]  ;;  %v2301_v47 = vpack.c.bf16 %v754_v44, %v753_v43  ;;  %v929_v49 = vld [vmem:[#allocation13 + $0x10] sm:$0xff]  ;;  %v930_v50 = vld [vmem:[#allocation13 + $0x18] sm:$0xff] }
  0xa1   : > { %v2313_v48 = vpack.c.bf16 %v928_v46, %v927_v45  ;;  %v755_v51 = vld [vmem:[#allocation11 + $0x60] sm:$0xff]  ;;  %v756_v52 = vld [vmem:[#allocation11 + $0x68] sm:$0xff]  ;;  %v545_v54 = vld [vmem:[%s3175_s9 + $0x10] sm:$0xff]  ;;  %v2317_v55 = vpack.c.bf16 %v930_v50, %v929_v49 }
  0xa2   : > { %2260 = vmatpush3.bf16.msra.mxu0 %v2257_v11  ;;  %2288 = vmatpush3.bf16.msra.mxu1 %v2285_v26  ;;  %v544_v53 = vld [vmem:[%s3175_s9 + $0x8] sm:$0xff]  ;;  %v2305_v56 = vpack.c.bf16 %v756_v52, %v755_v51  ;;  %v931_v57 = vld [vmem:[#allocation13 + $0x20] sm:$0xff]  ;;  %v546_v59 = vld [vmem:[%s3175_s9 + $0x18] sm:$0xff] }
  0xa3   : > { %2262 = vmatprep.subr.bf16.mxu0 %v2261_v15  ;;  %2290 = vmatprep.subr.bf16.mxu1 %v2289_v29  ;;  %v932_v58 = vld [vmem:[#allocation13 + $0x28] sm:$0xff]  ;;  %v547_v60 = vld [vmem:[%s3175_s9 + $0x20] sm:$0xff]  ;;  %v933_v62 = vld [vmem:[#allocation13 + $0x30] sm:$0xff] }
  0xa4   : > { %v2321_v61 = vpack.c.bf16 %v932_v58, %v931_v57  ;;  %v934_v63 = vld [vmem:[#allocation13 + $0x38] sm:$0xff]  ;;  %v548_v0 = vld [vmem:[%s3175_s9 + $0x28] sm:$0xff]  ;;  %v549_v1 = vld [vmem:[%s3175_s9 + $0x30] sm:$0xff] }
  0xa5   : > { %v2325_v2 = vpack.c.bf16 %v934_v63, %v933_v62  ;;  %v935_v3 = vld [vmem:[#allocation13 + $0x40] sm:$0xff]  ;;  %v936_v4 = vld [vmem:[#allocation13 + $0x48] sm:$0xff]  ;;  %v550_v5 = vld [vmem:[%s3175_s9 + $0x38] sm:$0xff] }
  0xa6   : > { %2264 = vmatpush3.bf16.msra.mxu0 %v2261_v15  ;;  %2292 = vmatpush3.bf16.msra.mxu1 %v2289_v29  ;;  %v551_v6 = vld [vmem:[%s3175_s9 + $0x40] sm:$0xff]  ;;  %v2329_v7 = vpack.c.bf16 %v936_v4, %v935_v3  ;;  %v937_v8 = vld [vmem:[#allocation13 + $0x50] sm:$0xff]  ;;  %v938_v9 = vld [vmem:[#allocation13 + $0x58] sm:$0xff] }
  0xa7   : > { %2266 = vmatprep.subr.bf16.mxu0 %v2265_v22  ;;  %2294 = vmatprep.subr.bf16.mxu1 %v2293_v35  ;;  %v552_v10 = vld [vmem:[%s3175_s9 + $0x48] sm:$0xff]  ;;  %v553_v11 = vld [vmem:[%s3175_s9 + $0x50] sm:$0xff]  ;;  %v2333_v12 = vpack.c.bf16 %v938_v9, %v937_v8  ;;  %v939_v13 = vld [vmem:[#allocation13 + $0x60] sm:$0xff] }
  0xa8   : > { %v940_v14 = vld [vmem:[#allocation13 + $0x68] sm:$0xff]  ;;  %v554_v15 = vld [vmem:[%s3175_s9 + $0x58] sm:$0xff]  ;;  %v555_v16 = vld [vmem:[%s3175_s9 + $0x60] sm:$0xff] }
  0xa9   : > { %v2337_v17 = vpack.c.bf16 %v940_v14, %v939_v13  ;;  %v556_v18 = vld [vmem:[%s3175_s9 + $0x68] sm:$0xff]  ;;  %v557_v19 = vld [vmem:[%s3175_s9 + $0x70] sm:$0xff]  ;;  %v558_v20 = vld [vmem:[%s3175_s9 + $0x78] sm:$0xff] }
  0xaa   : > { %2268 = vmatpush3.bf16.msra.mxu0 %v2265_v22  ;;  %2296 = vmatpush3.bf16.msra.mxu1 %v2293_v35  ;;  %v941_v21 = vld [vmem:[#allocation13 + $0x70] sm:$0xff]  ;;  %v942_v22 = vld [vmem:[#allocation13 + $0x78] sm:$0xff] }
  0xab   : > { %2270 = vmatprep.subr.bf16.mxu0 %v2269_v30  ;;  %2298 = vmatprep.subr.bf16.mxu1 %v2297_v41  ;;  %v2341_v23 = vpack.c.bf16 %v942_v22, %v941_v21  ;;  %v757_v24 = vld [vmem:[#allocation11 + $0x70] sm:$0xff]  ;;  %v758_v25 = vld [vmem:[#allocation11 + $0x78] sm:$0xff]  ;;  %v2872_v21 = vmov 0.0  }
  0xac   : > { %v2309_v26 = vpack.c.bf16 %v758_v25, %v757_v24  ;;  %v3261_v28 = vld [vmem:[%s3526_s3] ss:$0 sm:$0xff]  ;;  %v1208_v22 = vld [vmem:[#allocation7] sm:$0x1] }
  0xad   : > { %v3289_v24 = vld [vmem:[%s3528_s5] ss:$0 sm:$0xff] }
  0xae   : > { %2272 = vmatpush3.bf16.msra.mxu0 %v2269_v30  ;;  %2300 = vmatpush3.bf16.msra.mxu1 %v2297_v41  ;;  %v3294_v25 = vld [vmem:[%s3530_s7] ss:$0 sm:$0xff] }
  0xaf   : > { %2274 = vmatprep.subr.bf16.mxu0 %v2273_v36  ;;  %2302 = vmatprep.subr.bf16.mxu1 %v2301_v47 }
  0xb2   : > { %2276 = vmatpush3.bf16.msra.mxu0 %v2273_v36  ;;  %2304 = vmatpush3.bf16.msra.mxu1 %v2301_v47 }
  0xb3   : > { %2278 = vmatprep.subr.bf16.mxu0 %v2277_v42  ;;  %2306 = vmatprep.subr.bf16.mxu1 %v2305_v56 }
  0xb6   : > { %2280 = vmatpush3.bf16.msra.mxu0 %v2277_v42  ;;  %2308 = vmatpush3.bf16.msra.mxu1 %v2305_v56 }
  0xb7   : > { %2314 = vmatprep.subr.bf16.mxu0 %v2313_v48  ;;  %2310 = vmatprep.subr.bf16.mxu1 %v2309_v26 }
  0xb9   : > { %1974 = vmatmul.mubr.f32.vlgmr.msra.gmra.mrb[0].mxu0 %v544_v53 }
  0xba   : > { %1976 = vmatprep.mubr.f32.mxu0 %v545_v54  ;;  %2316 = vmatpush3.bf16.msra.mxu0 %v2313_v48 }
  0xbb   : > { %2318 = vmatprep.subr.bf16.mxu0 %v2317_v55  ;;  %2312 = vmatpush3.bf16.msra.mxu1 %v2309_v26 }
  0xbc   : > { %2345 = vmatprep.subr.bf16.mxu1 %v2870_v27 }
  0xbd   : > { %1977 = vmatmul.mubr.f32.gmra.mrb[2].mxu0 %v546_v59 }
  0xbe   : > { %1979 = vmatprep.mubr.f32.mxu0 %v547_v60  ;;  %2320 = vmatpush3.bf16.msra.mxu0 %v2317_v55 }
  0xbf   : > { %2322 = vmatprep.subr.bf16.mxu0 %v2321_v61 }
  0xc1   : > { %1980 = vmatmul.mubr.f32.gmra.mrb[4].mxu0 %v548_v0 }
  0xc2   : > { %1982 = vmatprep.mubr.f32.mxu0 %v549_v1  ;;  %2324 = vmatpush3.bf16.msra.mxu0 %v2321_v61 }
  0xc3   : > { %2326 = vmatprep.subr.bf16.mxu0 %v2325_v2 }
  0xc5   : > { %1983 = vmatmul.mubr.f32.gmra.mrb[6].mxu0 %v550_v5 }
  0xc6   : > { %1985 = vmatprep.mubr.f32.mxu0 %v551_v6  ;;  %2328 = vmatpush3.bf16.msra.mxu0 %v2325_v2 }
  0xc7   : > { %2330 = vmatprep.subr.bf16.mxu0 %v2329_v7 }
  0xc9   : > { %1986 = vmatmul.mubr.f32.gmra.mrb[8].mxu0 %v552_v10 }
  0xca   : > { %1988 = vmatprep.mubr.f32.mxu0 %v553_v11  ;;  %2332 = vmatpush3.bf16.msra.mxu0 %v2329_v7 }
  0xcb   : > { %2334 = vmatprep.subr.bf16.mxu0 %v2333_v12 }
  0xcd   : > { %1989 = vmatmul.mubr.f32.gmra.mrb[10].mxu0 %v554_v15 }
  0xce   : > { %1991 = vmatprep.mubr.f32.mxu0 %v555_v16  ;;  %2336 = vmatpush3.bf16.msra.mxu0 %v2333_v12 }
  0xcf   : > { %2338 = vmatprep.subr.bf16.mxu0 %v2337_v17 }
  0xd1   : > { %1992 = vmatmul.mubr.f32.gmra.mrb[12].mxu0 %v556_v18 }
  0xd2   : > { %1994 = vmatprep.mubr.f32.mxu0 %v557_v19  ;;  %2340 = vmatpush3.bf16.msra.mxu0 %v2337_v17 }
  0xd3   : > { %2342 = vmatprep.subr.bf16.mxu0 %v2341_v23 }
  0xd5   : > { %1995 = vmatmul.mubr.f32.gmra.mrb[14].mxu0 %v558_v20 }
  0xd6   : > { %2344 = vmatpush3.bf16.msra.mxu0 %v2341_v23  ;;  %v2873_v23 = vmov 0  }
  0xd7   : > { %2369 = vmatprep.subr.bf16.mxu0 %v2870_v27  ;;  %2537 = vset.pattern.permute.xlu0 %v2873_v23 }
  0xd8   : > { %2538 = vset.pattern.permute.xlu1 %v2873_v23  ;;  %1211 = vperm.xlu0 %2537, %v1208_v22  }
 0x18c   : > { %v1975_v29 = vpop.f32.mrb[0].mxu0 }
 0x18d   : > { %v654_v30 = vadd.f32 %v1975_v29, %v3261_v28  ;;  %v648_v31 = vpop.f32.mrb[1].mxu0 }
 0x18e   : > { %v649_v32 = vadd.f32 %v3261_v28, %v648_v31 }
 0x18f   : > { %v728_v33 = vmax.f32 %v654_v30, 0.0 }
 0x190   : > { %v727_v34 = vmax.f32 %v649_v32, 0.0  ;;  %v1978_v35 = vpop.f32.mrb[2].mxu0 }
 0x191   : > { %v664_v36 = vadd.f32 %v1978_v35, %v3261_v28  ;;  %v658_v37 = vpop.f32.mrb[3].mxu0 }
 0x192   : > { %v2370_v38 = vpack.c.bf16 %v728_v33, %v727_v34  ;;  %v659_v39 = vadd.f32 %v3261_v28, %v658_v37  ;;  %2029 = vmatprep.mubr.f32.mxu1 %v727_v34  ;;  %2085 = vmatprep.mubr.f32.mxu0 %v727_v34 }
 0x193   : > { %v730_v40 = vmax.f32 %v664_v36, 0.0  ;;  %2030 = vmatmul.mubr.f32.vlgmr.msra.gmra.mrb[0].mxu1 %v728_v33  ;;  %2086 = vmatmul.mubr.f32.vlgmr.msra.gmra.mrb[16].mxu0 %v728_v33 }
 0x194   : > { %v729_v41 = vmax.f32 %v659_v39, 0.0  ;;  %v1981_v42 = vpop.f32.mrb[4].mxu0  ;;  %2371 = vmatpush3.bf16.msra.mxu0 %v2370_v38 }
 0x195   : > { %v674_v43 = vadd.f32 %v1981_v42, %v3261_v28  ;;  %v668_v44 = vpop.f32.mrb[5].mxu0  ;;  %2372 = vmatprep.subr.bf16.mxu0 %v2870_v27 }
 0x196   : > { %v2373_v45 = vpack.c.bf16 %v730_v40, %v729_v41  ;;  %v669_v46 = vadd.f32 %v3261_v28, %v668_v44  ;;  %2088 = vmatprep.mubr.f32.mxu0 %v729_v41  ;;  %2032 = vmatprep.mubr.f32.mxu1 %v729_v41 }
 0x197   : > { %v732_v47 = vmax.f32 %v674_v43, 0.0  ;;  %2089 = vmatmul.mubr.f32.gmra.mrb[18].mxu0 %v730_v40  ;;  %2033 = vmatmul.mubr.f32.gmra.mrb[2].mxu1 %v730_v40 }
 0x198   : > { %v731_v48 = vmax.f32 %v669_v46, 0.0  ;;  %v1984_v49 = vpop.f32.mrb[6].mxu0  ;;  %2374 = vmatpush3.bf16.msra.mxu0 %v2373_v45 }
 0x199   : > { %v684_v50 = vadd.f32 %v1984_v49, %v3261_v28  ;;  %v678_v51 = vpop.f32.mrb[7].mxu0  ;;  %2375 = vmatprep.subr.bf16.mxu0 %v2870_v27 }
 0x19a   : > { %v2376_v52 = vpack.c.bf16 %v732_v47, %v731_v48  ;;  %v679_v53 = vadd.f32 %v3261_v28, %v678_v51  ;;  %2091 = vmatprep.mubr.f32.mxu0 %v731_v48  ;;  %2035 = vmatprep.mubr.f32.mxu1 %v731_v48 }
 0x19b   : > { %v734_v54 = vmax.f32 %v684_v50, 0.0  ;;  %2092 = vmatmul.mubr.f32.gmra.mrb[20].mxu0 %v732_v47  ;;  %2036 = vmatmul.mubr.f32.gmra.mrb[4].mxu1 %v732_v47 }
 0x19c   : > { %v733_v55 = vmax.f32 %v679_v53, 0.0  ;;  %v1987_v56 = vpop.f32.mrb[8].mxu0  ;;  %2377 = vmatpush3.bf16.msra.mxu0 %v2376_v52 }
 0x19d   : > { %v694_v57 = vadd.f32 %v1987_v56, %v3261_v28  ;;  %v688_v58 = vpop.f32.mrb[9].mxu0  ;;  %2378 = vmatprep.subr.bf16.mxu0 %v2870_v27 }
 0x19e   : > { %v2379_v59 = vpack.c.bf16 %v734_v54, %v733_v55  ;;  %v689_v60 = vadd.f32 %v3261_v28, %v688_v58  ;;  %2094 = vmatprep.mubr.f32.mxu0 %v733_v55  ;;  %2038 = vmatprep.mubr.f32.mxu1 %v733_v55 }
 0x19f   : > { %v736_v61 = vmax.f32 %v694_v57, 0.0  ;;  %2095 = vmatmul.mubr.f32.gmra.mrb[22].mxu0 %v734_v54  ;;  %2039 = vmatmul.mubr.f32.gmra.mrb[6].mxu1 %v734_v54 }
 0x1a0   : > { %v735_v62 = vmax.f32 %v689_v60, 0.0  ;;  %v1990_v63 = vpop.f32.mrb[10].mxu0  ;;  %2380 = vmatpush3.bf16.msra.mxu0 %v2379_v59 }
 0x1a1   : > { %v704_v0 = vadd.f32 %v1990_v63, %v3261_v28  ;;  %v698_v1 = vpop.f32.mrb[11].mxu0  ;;  %2381 = vmatprep.subr.bf16.mxu0 %v2870_v27 }
 0x1a2   : > { %v2382_v2 = vpack.c.bf16 %v736_v61, %v735_v62  ;;  %2097 = vmatprep.mubr.f32.mxu0 %v735_v62  ;;  %v699_v3 = vadd.f32 %v3261_v28, %v698_v1  ;;  %2041 = vmatprep.mubr.f32.mxu1 %v735_v62 }
 0x1a3   : > { %v738_v4 = vmax.f32 %v704_v0, 0.0  ;;  %2098 = vmatmul.mubr.f32.gmra.mrb[24].mxu0 %v736_v61  ;;  %2042 = vmatmul.mubr.f32.gmra.mrb[8].mxu1 %v736_v61 }
 0x1a4   : > { %v737_v5 = vmax.f32 %v699_v3, 0.0  ;;  %v1993_v6 = vpop.f32.mrb[12].mxu0  ;;  %2383 = vmatpush3.bf16.msra.mxu0 %v2382_v2 }
 0x1a5   : > { %v714_v7 = vadd.f32 %v1993_v6, %v3261_v28  ;;  %v708_v8 = vpop.f32.mrb[13].mxu0  ;;  %2384 = vmatprep.subr.bf16.mxu0 %v2870_v27 }
 0x1a6   : > { %v2385_v9 = vpack.c.bf16 %v738_v4, %v737_v5  ;;  %2100 = vmatprep.mubr.f32.mxu0 %v737_v5  ;;  %v709_v10 = vadd.f32 %v3261_v28, %v708_v8  ;;  %2044 = vmatprep.mubr.f32.mxu1 %v737_v5 }
 0x1a7   : > { %2101 = vmatmul.mubr.f32.gmra.mrb[26].mxu0 %v738_v4  ;;  %v740_v11 = vmax.f32 %v714_v7, 0.0  ;;  %2045 = vmatmul.mubr.f32.gmra.mrb[10].mxu1 %v738_v4 }
 0x1a8   : > { %v739_v12 = vmax.f32 %v709_v10, 0.0  ;;  %v1996_v13 = vpop.f32.mrb[14].mxu0  ;;  %2386 = vmatpush3.bf16.msra.mxu0 %v2385_v9 }
 0x1a9   : > { %v724_v14 = vadd.f32 %v1996_v13, %v3261_v28  ;;  %v718_v15 = vpop.f32.mrb[15].mxu0  ;;  %2387 = vmatprep.subr.bf16.mxu0 %v2870_v27 }
 0x1aa   : > { %v2388_v16 = vpack.c.bf16 %v740_v11, %v739_v12  ;;  %2103 = vmatprep.mubr.f32.mxu0 %v739_v12  ;;  %v719_v17 = vadd.f32 %v3261_v28, %v718_v15  ;;  %2047 = vmatprep.mubr.f32.mxu1 %v739_v12 }
 0x1ab   : > { %2104 = vmatmul.mubr.f32.gmra.mrb[28].mxu0 %v740_v11  ;;  %v742_v18 = vmax.f32 %v724_v14, 0.0  ;;  %2048 = vmatmul.mubr.f32.gmra.mrb[12].mxu1 %v740_v11 }
 0x1ac   : > { %v741_v19 = vmax.f32 %v719_v17, 0.0  ;;  %2389 = vmatpush3.bf16.msra.mxu0 %v2388_v16 }
 0x1ad   : > { %2390 = vmatprep.subr.bf16.mxu0 %v2870_v27 }
 0x1ae   : > { %v2391_v20 = vpack.c.bf16 %v742_v18, %v741_v19  ;;  %2106 = vmatprep.mubr.f32.mxu0 %v741_v19  ;;  %2050 = vmatprep.mubr.f32.mxu1 %v741_v19 }
 0x1af   : > { %2107 = vmatmul.mubr.f32.gmra.mrb[30].mxu0 %v742_v18  ;;  %2051 = vmatmul.mubr.f32.gmra.mrb[14].mxu1 %v742_v18 }
 0x1b0   : > { %2392 = vmatpush3.bf16.msra.mxu0 %v2391_v20  ;;  %2141 = vmatprep.mubr.msk.f32.mxu1 %vm2871_vm2, %v2872_v21 }
 0x1b1   : > { %2176 = vmatprep.mubr.msk.f32.mxu0 %vm2871_vm2, %v2872_v21 }
 0x266   : > { %v2031_v26 = vpop.f32.mrb[0].mxu1  ;;  %v2087_v28 = vpop.f32.mrb[16].mxu0 }
 0x267   : > { %v838_v29 = vadd.f32 %v2031_v26, %v3289_v24  ;;  %v1022_v30 = vadd.f32 %v2087_v28, %v3294_v25  ;;  %v832_v31 = vpop.f32.mrb[1].mxu1  ;;  %v1016_v32 = vpop.f32.mrb[17].mxu0 }
 0x268   : > { %v833_v33 = vadd.f32 %v3289_v24, %v832_v31  ;;  %v1017_v34 = vadd.f32 %v3294_v25, %v1016_v32 }
 0x269   : > { %2539 = vtanh.f32 %v838_v29  ;;  %v1754_v35 = vmul.f32 -1.442695, %v1022_v30 }
 0x26a   : > { %2541 = vtanh.f32 %v833_v33  ;;  %v1753_v36 = vmul.f32 -1.442695, %v1017_v34  ;;  %v2090_v37 = vpop.f32.mrb[18].mxu0  ;;  %v2034_v38 = vpop.f32.mrb[2].mxu1 }
 0x26b   : > { %2543 = vpow2.f32 %v1754_v35  ;;  %v1032_v39 = vadd.f32 %v2090_v37, %v3294_v25  ;;  %v848_v40 = vadd.f32 %v2034_v38, %v3289_v24  ;;  %v1026_v41 = vpop.f32.mrb[19].mxu0  ;;  %v842_v42 = vpop.f32.mrb[3].mxu1 }
 0x26c   : > { %2545 = vpow2.f32 %v1753_v36  ;;  %v1027_v43 = vadd.f32 %v3294_v25, %v1026_v41  ;;  %v843_v44 = vadd.f32 %v3289_v24, %v842_v42 }
 0x26d   : > { %v1756_v45 = vmul.f32 -1.442695, %v1032_v39  ;;  %2547 = vtanh.f32 %v848_v40 }
 0x26e   : > { %v1755_v46 = vmul.f32 -1.442695, %v1027_v43  ;;  %2549 = vtanh.f32 %v843_v44  ;;  %v2093_v47 = vpop.f32.mrb[20].mxu0  ;;  %v2037_v48 = vpop.f32.mrb[4].mxu1 }
 0x26f   : > { %2551 = vpow2.f32 %v1756_v45  ;;  %v1042_v49 = vadd.f32 %v2093_v47, %v3294_v25  ;;  %v1036_v50 = vpop.f32.mrb[21].mxu0  ;;  %v858_v51 = vadd.f32 %v2037_v48, %v3289_v24  ;;  %v852_v52 = vpop.f32.mrb[5].mxu1 }
 0x270   : > { %2553 = vpow2.f32 %v1755_v46  ;;  %v1037_v53 = vadd.f32 %v3294_v25, %v1036_v50  ;;  %v853_v54 = vadd.f32 %v3289_v24, %v852_v52 }
 0x271   : > { %v1758_v55 = vmul.f32 -1.442695, %v1042_v49  ;;  %2555 = vtanh.f32 %v858_v51 }
 0x272   : > { %v1757_v56 = vmul.f32 -1.442695, %v1037_v53  ;;  %v2096_v57 = vpop.f32.mrb[22].mxu0  ;;  %2557 = vtanh.f32 %v853_v54  ;;  %v2040_v58 = vpop.f32.mrb[6].mxu1 }
 0x273   : > { %v3308_v59 = vpop.eup %2539  ;;  %2559 = vpow2.f32 %v1758_v55  ;;  %v1052_v60 = vadd.f32 %v2096_v57, %v3294_v25  ;;  %v1046_v61 = vpop.f32.mrb[23].mxu0  ;;  %v868_v62 = vadd.f32 %v2040_v58, %v3289_v24 }
 0x274   : > { %v862_v63 = vpop.f32.mrb[7].mxu1  ;;  %v3312_v0 = vpop.eup %2541  ;;  %2561 = vpow2.f32 %v1757_v56  ;;  %v1047_v1 = vadd.f32 %v3294_v25, %v1046_v61 }
 0x275   : > { %v863_v2 = vadd.f32 %v3289_v24, %v862_v63  ;;  %v2544_v3 = vpop.eup %2543  ;;  %v1760_v4 = vmul.f32 -1.442695, %v1052_v60  ;;  %2563 = vtanh.f32 %v868_v62 }
 0x276   : > { %v2546_v5 = vpop.eup %2545  ;;  %v1144_v6 = vadd.f32 1.0, %v2544_v3  ;;  %v1759_v7 = vmul.f32 -1.442695, %v1047_v1  ;;  %v2099_v8 = vpop.f32.mrb[24].mxu0 }
 0x277   : > { %2565 = vtanh.f32 %v863_v2  ;;  %v2043_v9 = vpop.f32.mrb[8].mxu1  ;;  %v3316_v10 = vpop.eup %2547  ;;  %v1143_v11 = vadd.f32 1.0, %v2546_v5  ;;  %v1062_v12 = vadd.f32 %v2099_v8, %v3294_v25 }
 0x278   : > { %2567 = vpow2.f32 %v1760_v4  ;;  %v1056_v13 = vpop.f32.mrb[25].mxu0  ;;  %v872_v14 = vpop.f32.mrb[9].mxu1  ;;  %v878_v43 = vadd.f32 %v2043_v9, %v3289_v24 }
 0x279   : > { %v3319_v15 = vpop.eup %2549  ;;  %2569 = vrcp.f32 %v1144_v6  ;;  %v1057_v16 = vadd.f32 %v3294_v25, %v1056_v13  ;;  %v1762_v18 = vmul.f32 -1.442695, %v1062_v12  ;;  %v873_v49 = vadd.f32 %v3289_v24, %v872_v14 }
 0x27a   : > { %v2552_v17 = vpop.eup %2551  ;;  %2571 = vrcp.f32 %v1143_v11  ;;  %v2102_v22 = vpop.f32.mrb[26].mxu0 }
 0x27b   : > { %v2554_v19 = vpop.eup %2553  ;;  %v1146_v20 = vadd.f32 1.0, %v2552_v17  ;;  %2573 = vpow2.f32 %v1759_v7  ;;  %v1761_v21 = vmul.f32 -1.442695, %v1057_v16  ;;  %v2046_v23 = vpop.f32.mrb[10].mxu1  ;;  %v1072_v29 = vadd.f32 %v2102_v22, %v3294_v25 }
 0x27c   : > { %v3322_v26 = vpop.eup %2555  ;;  %v1145_v28 = vadd.f32 1.0, %v2554_v19  ;;  %2575 = vpow2.f32 %v1762_v18  ;;  %v1066_v30 = vpop.f32.mrb[27].mxu0  ;;  %v888_v3 = vadd.f32 %v2046_v23, %v3289_v24 }
 0x27d   : > { %v882_v31 = vpop.f32.mrb[11].mxu1  ;;  %v3325_v32 = vpop.eup %2557  ;;  %2577 = vrcp.f32 %v1146_v20  ;;  %v1067_v33 = vadd.f32 %v3294_v25, %v1066_v30  ;;  %v1764_v35 = vmul.f32 -1.442695, %v1072_v29 }
 0x27e   : > { %v2560_v34 = vpop.eup %2559  ;;  %2579 = vrcp.f32 %v1145_v28  ;;  %v2105_v39 = vpop.f32.mrb[28].mxu0  ;;  %v883_v14 = vadd.f32 %v3289_v24, %v882_v31 }
 0x27f   : > { %v2562_v36 = vpop.eup %2561  ;;  %v1148_v37 = vadd.f32 1.0, %v2560_v34  ;;  %2581 = vpow2.f32 %v1761_v21  ;;  %v1763_v38 = vmul.f32 -1.442695, %v1067_v33  ;;  %v3328_v40 = vpop.f32.mrb[12].mxu1  ;;  %v1082_v44 = vadd.f32 %v2105_v39, %v3294_v25 }
 0x280   : > { %v3330_v41 = vpop.eup %2563  ;;  %v1147_v42 = vadd.f32 1.0, %v2562_v36  ;;  %2583 = vpow2.f32 %v1764_v35  ;;  %v1076_v45 = vpop.f32.mrb[29].mxu0  ;;  %v898_v28 = vadd.f32 %v3328_v40, %v3289_v24 }
 0x281   : > { %v3334_v46 = vpop.f32.mrb[13].mxu1  ;;  %v3336_v47 = vpop.eup %2565  ;;  %2585 = vrcp.f32 %v1148_v37  ;;  %v1077_v50 = vadd.f32 %v3294_v25, %v1076_v45  ;;  %v1766_v53 = vmul.f32 -1.442695, %v1082_v44 }
 0x282   : > { %v2568_v48 = vpop.eup %2567  ;;  %2587 = vrcp.f32 %v1147_v42  ;;  %v2108_v54 = vpop.f32.mrb[30].mxu0 }
 0x283   : > { %v2570_v51 = vpop.eup %2569  ;;  %v1150_v52 = vadd.f32 1.0, %v2568_v48  ;;  %2589 = vpow2.f32 %v1763_v38  ;;  %v3340_v55 = vpop.f32.mrb[14].mxu1  ;;  %v1765_v2 = vmul.f32 -1.442695, %v1077_v50  ;;  %v1092_v7 = vadd.f32 %v2108_v54, %v3294_v25 }
 0x284   : > { %v2572_v56 = vpop.eup %2571  ;;  %2591 = vtanh.f32 %v878_v43  ;;  %v1192_v57 = vmul.f32 %v2570_v51, %v3308_v59  ;;  %v1086_v58 = vpop.f32.mrb[31].mxu0  ;;  %v908_v44 = vadd.f32 %v3340_v55, %v3289_v24 }
 0x285   : > { %v3343_v60 = vpop.f32.mrb[15].mxu1  ;;  %v2574_v61 = vpop.eup %2573  ;;  %2593 = vrcp.f32 %v1150_v52  ;;  %v1191_v62 = vmul.f32 %v2572_v56, %v3312_v0  ;;  %v1087_v0 = vadd.f32 %v3294_v25, %v1086_v58  ;;  %v1768_v18 = vmul.f32 -1.442695, %v1092_v7 }
 0x286   : > { %v2576_v63 = vpop.eup %2575  ;;  %v1149_v1 = vadd.f32 1.0, %v2574_v61  ;;  %2595 = vtanh.f32 %v873_v49 }
 0x287   : > { %v2578_v4 = vpop.eup %2577  ;;  %v1152_v5 = vadd.f32 1.0, %v2576_v63  ;;  %2597 = vpow2.f32 %v1766_v53  ;;  %v2346_v6 = vpack.c.bf16 %v1192_v57, %v1191_v62  ;;  %v1767_v25 = vmul.f32 -1.442695, %v1087_v0 }
 0x288   : > { %v2580_v59 = vpop.eup %2579  ;;  %2599 = vrcp.f32 %v1149_v1  ;;  %v1194_v8 = vmul.f32 %v2578_v4, %v3316_v10 }
 0x289   : > { %v2582_v9 = vpop.eup %2581  ;;  %2601 = vrcp.f32 %v1152_v5  ;;  %2347 = vmatpush3.bf16.xpose.msra.mxu1 %v2346_v6  ;;  %v1193_v11 = vmul.f32 %v2580_v59, %v3319_v15 }
 0x28a   : > { %v2584_v12 = vpop.eup %2583  ;;  %v1151_v13 = vadd.f32 1.0, %v2582_v9  ;;  %2603 = vpow2.f32 %v1765_v2  ;;  %2348 = vmatprep.subr.bf16.mxu1 %v2870_v27  ;;  %v1214_v9 = vlaneseq }
 0x28b   : > { %v2586_v16 = vpop.eup %2585  ;;  %v1154_v17 = vadd.f32 1.0, %v2584_v12  ;;  %2605 = vtanh.f32 %v888_v3  ;;  %v2349_v19 = vpack.c.bf16 %v1194_v8, %v1193_v11  ;;  %v1207_v8 = vld [vmem:[%s3531_s8] sm:$0x1] }
 0x28c   : > { %v2588_v10 = vpop.eup %2587  ;;  %2607 = vrcp.f32 %v1151_v13  ;;  %v1196_v20 = vmul.f32 %v2586_v16, %v3322_v26  ;;  %v893_v26 = vadd.f32 %v3289_v24, %v3334_v46  ;;  %v903_v46 = vadd.f32 %v3289_v24, %v3343_v60 }
 0x28d   : > { %v2590_v21 = vpop.eup %2589  ;;  %2609 = vrcp.f32 %v1154_v17  ;;  %v1195_v15 = vmul.f32 %v2588_v10, %v3325_v32  ;;  %v1215_v0 = vshrl.u32 %v1214_v9, 7  ;;  %v1289_v11 = vand.u32 127, %v1214_v9 }
 0x28e   : > { %v2592_v22 = vpop.eup %2591  ;;  %v1153_v23 = vadd.f32 1.0, %v2590_v21  ;;  %2611 = vtanh.f32 %v883_v14  ;;  %v1291_v13 = vstv %s1769_s18  ;;  %v1212_v14 = vpop.permute.xlu0 %1211 }
 0x28f   : > { %v2594_v29 = vpop.eup %2593  ;;  %2613 = vpow2.f32 %v1768_v18  ;;  %v2352_v30 = vpack.c.bf16 %v1196_v20, %v1195_v15  ;;  %v3375_v12 = vsub.s32 0, %v1215_v0  ;;  %v1292_v16 = vadd.s32 %v1291_v13, %v1289_v11  ;;  %v1440_v0 = vld [vmem:[#allocation14 + $0x60] sm:$0xff] (!%p1770_p3)  ;;  %v1441_v13 = vld [vmem:[#allocation14 + $0x68] sm:$0xff] (!%p1770_p3) }
 0x290   : > { %v2596_v31 = vpop.eup %2595  ;;  %2615 = vrcp.f32 %v1153_v23  ;;  %v1198_v33 = vmul.f32 %v2594_v29, %v3330_v41 }
 0x291   : > { %v2598_v34 = vpop.eup %2597  ;;  %2617 = vpow2.f32 %v1767_v25  ;;  %2350 = vmatpush3.bf16.xpose.msra.mxu1 %v2349_v19  ;;  %v1217_v17 = vrot.slane %v1212_v14, %v3375_v12  ;;  %v1298_v25 = vld [vmem:[#allocation2] sm:$0x1] }
 0x292   : > { %v2600_v32 = vpop.eup %2599  ;;  %v1156_v35 = vadd.f32 1.0, %v2598_v34  ;;  %2619 = vtanh.f32 %v898_v28  ;;  %2351 = vmatprep.subr.bf16.mxu1 %v2870_v27  ;;  %v1520_v14 = vld [vmem:[%s3569_s29 + $0x20] sm:$0xff] (!%p1770_p3) }
 0x293   : > { %v2602_v36 = vpop.eup %2601  ;;  %v1197_v37 = vmul.f32 %v2600_v32, %v3336_v47 }
 0x294   : > { %v2604_v38 = vpop.eup %2603  ;;  %2621 = vrcp.f32 %v1156_v35  ;;  %v1200_v39 = vmul.f32 %v2602_v36, %v2592_v22  ;;  %v1319_v35 = vld [vmem:[#allocation3] sm:$0x1] }
 0x295   : > { %v2606_v40 = vpop.eup %2605  ;;  %v1155_v42 = vadd.f32 1.0, %v2604_v38  ;;  %2623 = vtanh.f32 %v893_v26  ;;  %v2355_v41 = vpack.c.bf16 %v1198_v33, %v1197_v37 }
 0x296   : > { %v2608_v43 = vpop.eup %2607 }
 0x297   : > { %v2610_v45 = vpop.eup %2609  ;;  %2625 = vrcp.f32 %v1155_v42  ;;  %v1199_v48 = vmul.f32 %v2608_v43, %v2596_v31  ;;  %v1327_v42 = vld [vmem:[#allocation4] sm:$0x1] }
 0x298   : > { %v2612_v49 = vpop.eup %2611  ;;  %v1202_v50 = vmul.f32 %v2610_v45, %v2606_v40  ;;  %2627 = vtanh.f32 %v908_v44 }
 0x299   : > { %v2614_v47 = vpop.eup %2613  ;;  %2353 = vmatpush3.bf16.xpose.msra.mxu1 %v2352_v30  ;;  %v2358_v51 = vpack.c.bf16 %v1200_v39, %v1199_v48  ;;  %2629 = vtanh.f32 %v903_v46  ;;  %v1428_v48 = vld [vmem:[#allocation14] sm:$0xff] (!%p1770_p3) }
 0x29a   : > { %v2616_v52 = vpop.eup %2615  ;;  %v1158_v53 = vadd.f32 1.0, %v2614_v47  ;;  %2354 = vmatprep.subr.bf16.mxu1 %v2870_v27  ;;  %v2875_v47 = vmov (!%p1770_p3), 0.0|0.0  }
 0x29b   : > { %v2618_v54 = vpop.eup %2617  ;;  %v1201_v56 = vmul.f32 %v2616_v52, %v2612_v49  ;;  %v1429_v49 = vld [vmem:[#allocation14 + $0x8] sm:$0xff] (!%p1770_p3)  ;;  %2393 = vmatprep.subr.bf16.mxu0 (!%p1770_p3), %v2875_v47  ;;  %v1430_v52 = vld [vmem:[#allocation14 + $0x10] sm:$0xff] (!%p1770_p3) }
 0x29c   : > { %v2620_v55 = vpop.eup %2619  ;;  %2631 = vrcp.f32 %v1158_v53  ;;  %v1157_v57 = vadd.f32 1.0, %v2618_v54  ;;  %v1431_v53 = vld [vmem:[#allocation14 + $0x18] sm:$0xff] (!%p1770_p3) }
 0x29d   : > { %v2361_v58 = vpack.c.bf16 %v1202_v50, %v1201_v56  ;;  %v2874_v50 = vmov (!%p1770_p3), 0   ;;  %v2397_v54 = vpack.c.bf16 (!%p1770_p3), %v1431_v53, %v1430_v52  ;;  %v1432_v56 = vld [vmem:[#allocation14 + $0x20] sm:$0xff] (!%p1770_p3) }
 0x29e   : > { %v2622_v61 = vpop.eup %2621  ;;  %2633 = vrcp.f32 %v1157_v57 }
 0x29f   : > { %v2624_v24 = vpop.eup %2623  ;;  %v1204_v60 = vmul.f32 %v2622_v61, %v2620_v55  ;;  %v1433_v55 = vld [vmem:[#allocation14 + $0x28] sm:$0xff] (!%p1770_p3)  ;;  %v1435_v61 = vld [vmem:[#allocation14 + $0x38] sm:$0xff] (!%p1770_p3) }
 0x2a0   : > { %v2400_v57 = vpack.c.bf16 (!%p1770_p3), %v1433_v55, %v1432_v56 }
 0x2a1   : > { %v2626_v62 = vpop.eup %2625  ;;  %2356 = vmatpush3.bf16.xpose.msra.mxu1 %v2355_v41 }
 0x2a2   : > { %2357 = vmatprep.subr.bf16.mxu1 %v2870_v27  ;;  %v1203_v63 = vmul.f32 %v2626_v62, %v2624_v24  ;;  %v2628_v1 = vpop.eup %2627  ;;  %v1436_v62 = vld [vmem:[#allocation14 + $0x40] sm:$0xff] (!%p1770_p3) }
 0x2a3   : > { %v2630_v3 = vpop.eup %2629 }
 0x2a4   : > { %v2364_v2 = vpack.c.bf16 %v1204_v60, %v1203_v63  ;;  %v1437_v63 = vld [vmem:[#allocation14 + $0x48] sm:$0xff] (!%p1770_p3) }
 0x2a6   : > { %v2632_v4 = vpop.eup %2631 }
 0x2a7   : > { %v1206_v5 = vmul.f32 %v2632_v4, %v2628_v1  ;;  %v2406_v1 = vpack.c.bf16 (!%p1770_p3), %v1437_v63, %v1436_v62  ;;  %v2877_v4 = vmov (!%p1770_p3), 0.0  }
 0x2a8   : > { %v2634_v6 = vpop.eup %2633 }
 0x2a9   : > { %2359 = vmatpush3.bf16.xpose.msra.mxu1 %v2358_v51  ;;  %v1205_v7 = vmul.f32 %v2634_v6, %v2630_v3  ;;  %v2394_v51 = vpack.c.bf16 (!%p1770_p3), %v1429_v49, %v1428_v48  ;;  %v1439_v3 = vld [vmem:[#allocation14 + $0x58] sm:$0xff] (!%p1770_p3)  ;;  %v1517_v6 = vld [vmem:[%s3569_s29 + $0x8] sm:$0xff] (!%p1770_p3) }
 0x2aa   : > { %2360 = vmatprep.subr.bf16.mxu1 %v2870_v27 }
 0x2ab   : > { %v2367_v59 = vpack.c.bf16 %v1206_v5, %v1205_v7  ;;  %v1516_v5 = vld [vmem:[%s3569_s29] sm:$0xff] (!%p1770_p3)  ;;  %v1518_v7 = vld [vmem:[%s3569_s29 + $0x10] sm:$0xff] (!%p1770_p3) }
 0x2b1   : > { %2362 = vmatpush3.bf16.xpose.msra.mxu1 %v2361_v58  ;;  %v1434_v58 = vld [vmem:[#allocation14 + $0x30] sm:$0xff] (!%p1770_p3) }
 0x2b2   : > { %2363 = vmatprep.subr.bf16.mxu1 %v2870_v27  ;;  %v2403_v60 = vpack.c.bf16 (!%p1770_p3), %v1435_v61, %v1434_v58 }
 0x2b9   : > { %2365 = vmatpush3.bf16.xpose.msra.mxu1 %v2364_v2  ;;  %v1438_v2 = vld [vmem:[#allocation14 + $0x50] sm:$0xff] (!%p1770_p3) }
 0x2ba   : > { %2366 = vmatprep.subr.bf16.mxu1 %v2870_v27  ;;  %v1294_v27 = vstv %s1293_s22  ;;  %v2409_v9 = vpack.c.bf16 (!%p1770_p3), %v1439_v3, %v1438_v2  ;;  %s3570_s22 = sld [smem:[#allocation26_spill]] (!%p1770_p3) }
 0x2bb   : > { %vm1295_vm3 = vcmp.lt.s32.totalorder %v1292_v16, %v1294_v27  ;;  %v1521_v16 = vld [vmem:[%s3569_s29 + $0x28] sm:$0xff] (!%p1770_p3)  ;;  %v1442_v27 = vld [vmem:[#allocation14 + $0x70] sm:$0xff] (!%p1770_p3) }
 0x2c1   : > { %2368 = vmatpush3.bf16.xpose.msra.mxu1 %v2367_v59  ;;  %v2418_v59 = vpack.c.bf16 (!%p1770_p3), %v1517_v6, %v1516_v5 }
 0x2c2   : > { %2417 = vmatprep.subr.bf16.mxu1 (!%p1770_p3), %v2875_v47 }
 0x2c8   : > { %2142 = vmatmul.mubr.f32.vlgmr.msra.gmra.mrb[16].mxu1 %v1207_v8  ;;  %v1519_v8 = vld [vmem:[%s3569_s29 + $0x18] sm:$0xff] (!%p1770_p3) }
 0x2c9   : > { %2246 = vmatprep.mubr.msk.f32.mxu1 (!%p1770_p3), %vm2876_vm6, %v2877_v4  ;;  %2419 = vmatpush3.bf16.msra.mxu1 (!%p1770_p3), %v2418_v59  ;;  %v2421_v11 = vpack.c.bf16 (!%p1770_p3), %v1519_v8, %v1518_v7 }
 0x2ca   : > { %2420 = vmatprep.subr.bf16.mxu1 (!%p1770_p3), %v2875_v47 }
 0x2cd   : > { %2422 = vmatpush3.bf16.msra.mxu1 (!%p1770_p3), %v2421_v11 }
 0x2ce   : > { %2423 = vmatprep.subr.bf16.mxu1 (!%p1770_p3), %v2875_v47 }
 0x39b   : > { %v1284_v18 = vpop.f32.mrb[16].mxu1 }
 0x39c   : > { %v1285_v19 = vadd.f32 %v1284_v18, %v1217_v17  ;;  %v2143_v10 = vpop.f32.mrb[17].mxu1  ;;  %v2412_v17 = vpack.c.bf16 (!%p1770_p3), %v1441_v13, %v1440_v0  ;;  %v2424_v18 = vpack.c.bf16 (!%p1770_p3), %v1521_v16, %v1520_v14 }
 0x39d   : > { %v1522_v10 = vld [vmem:[%s3569_s29 + $0x30] sm:$0xff] (!%p1770_p3) }
 0x39e   : > { %v1296_v20 = vsel %vm1295_vm3, %v1285_v19, -1e+30  ;;  %v1443_v19 = vld [vmem:[#allocation14 + $0x78] sm:$0xff] (!%p1770_p3)  ;;  %2425 = vmatpush3.bf16.msra.mxu1 (!%p1770_p3), %v2424_v18 }
 0x39f   : > { %1297 = vst [vmem:[%s529_s28] sm:$0x1] %v1296_v20  ;;  %v1300_v21 = vsel %vm1299_vm4, %v1296_v20, -inf  ;;  %2426 = vmatprep.subr.bf16.mxu1 (!%p1770_p3), %v2875_v47 }
 0x3a0   : > { %1301 = vmax.xlane.f32.xlu0 %v1300_v21  ;;  %v2415_v21 = vpack.c.bf16 (!%p1770_p3), %v1443_v19, %v1442_v27 }
 0x42d   : > { %v1302_v15 = vpop.xlane.xlu0 %1301 }
 0x42e   : > { %v1303_v22 = vmax.f32 %v1298_v25, %v1302_v15  ;;  %v1524_v15 = vld [vmem:[%s3569_s29 + $0x40] sm:$0xff] (!%p1770_p3) }
 0x430   : > { %v1304_v23 = vsub.f32 %v1298_v25, %v1303_v22  ;;  %1410 = vst.msk [vmem:[#allocation2] sm:$0x1] %vm1325_vm5, %v1303_v22  ;;  %1309 = vperm.xlu1 %2538, %v1303_v22   ;;  %v1525_v22 = vld [vmem:[%s3569_s29 + $0x48] sm:$0xff] (!%p1770_p3) }
 0x432   : > { %v1305_v28 = vmul.f32 1.442695, %v1304_v23  ;;  %v2430_v23 = vpack.c.bf16 (!%p1770_p3), %v1525_v22, %v1524_v15 }
 0x434   : > { %2635 = vpow2.f32 %v1305_v28  ;;  %v1526_v28 = vld [vmem:[%s3569_s29 + $0x50] sm:$0xff] (!%p1770_p3) }
 0x43e   : > { %v2636_v29 = vpop.eup %2635 }
 0x43f   : > { %1330 = vperm.xlu0 %2537, %v2636_v29   ;;  %v1320_v36 = vmul.f32 %v2636_v29, %v1319_v35  ;;  %v1527_v29 = vld [vmem:[%s3569_s29 + $0x58] sm:$0xff] (!%p1770_p3) }
 0x443   : > { %2639 = vset.pattern.permute.xlu0 (!%p1770_p3), %v2874_v50 }
 0x4af   : > { %v1310_v30 = vpop.permute.xlu1 %1309 }
 0x4b0   : > { %v1315_v31 = vrot.slane %v1310_v30, %v3375_v12  ;;  %v2433_v30 = vpack.c.bf16 (!%p1770_p3), %v1527_v29, %v1526_v28 }
 0x4b2   : > { %v1316_v33 = vsub.f32 %v1296_v20, %v1315_v31  ;;  %v1523_v20 = vld [vmem:[%s3569_s29 + $0x38] sm:$0xff] (!%p1770_p3)  ;;  %v1528_v31 = vld [vmem:[%s3569_s29 + $0x60] sm:$0xff] (!%p1770_p3) }
 0x4b3   : > { %v2427_v25 = vpack.c.bf16 (!%p1770_p3), %v1523_v20, %v1522_v10 }
 0x4b4   : > { %v1317_v34 = vmul.f32 1.442695, %v1316_v33  ;;  %v1529_v33 = vld [vmem:[%s3569_s29 + $0x68] sm:$0xff] (!%p1770_p3) }
 0x4b5   : > { %2428 = vmatpush3.bf16.msra.mxu1 (!%p1770_p3), %v2427_v25 }
 0x4b6   : > { %2637 = vpow2.f32 %v1317_v34  ;;  %2429 = vmatprep.subr.bf16.mxu1 (!%p1770_p3), %v2875_v47  ;;  %v2436_v34 = vpack.c.bf16 (!%p1770_p3), %v1529_v33, %v1528_v31 }
 0x4b9   : > { %2431 = vmatpush3.bf16.msra.mxu1 (!%p1770_p3), %v2430_v23 }
 0x4ba   : > { %2432 = vmatprep.subr.bf16.mxu1 (!%p1770_p3), %v2875_v47 }
 0x4bd   : > { %2434 = vmatpush3.bf16.msra.mxu1 (!%p1770_p3), %v2433_v30 }
 0x4be   : > { %v1331_v39 = vpop.permute.xlu0 %1330  ;;  %2435 = vmatprep.subr.bf16.mxu1 (!%p1770_p3), %v2875_v47 }
 0x4bf   : > { %v1336_v40 = vrot.slane %v1331_v39, %v3375_v12 }
 0x4c0   : > { %v2638_v26 = vpop.eup %2637 }
 0x4c1   : > { %2177 = vmatmul.mubr.f32.vlgmr.msra.gmra.mrb[32].mxu0 %v2638_v26  ;;  %v1321_v32 = vsel %vm1299_vm4, %v2638_v26, 0.0  ;;  %v1337_v41 = vmul.f32 %v1336_v40, %v1327_v42  ;;  %2437 = vmatpush3.bf16.msra.mxu1 (!%p1770_p3), %v2436_v34  ;;  %v1444_v40 = vld [vmem:[%s3570_s22] sm:$0x1] (!%p1770_p3) }
 0x4c2   : > { %1322 = vadd.xlane.f32.xlu1 %v1321_v32  ;;  %2395 = vmatpush3.bf16.msra.mxu0 (!%p1770_p3), %v2394_v51 }
 0x4c3   : > { %2396 = vmatprep.subr.bf16.mxu0 (!%p1770_p3), %v2875_v47  ;;  %2211 = vmatprep.mubr.msk.f32.mxu0 (!%p1770_p3), %vm2876_vm6, %v2877_v4 }
 0x4c4   : > { %2438 = vmatprep.subr.bf16.mxu1 (!%p1770_p3), %v2875_v47 }
 0x4c6   : > { %2398 = vmatpush3.bf16.msra.mxu0 (!%p1770_p3), %v2397_v54 }
 0x4c7   : > { %2399 = vmatprep.subr.bf16.mxu0 (!%p1770_p3), %v2875_v47 }
 0x4ca   : > { %2401 = vmatpush3.bf16.msra.mxu0 (!%p1770_p3), %v2400_v57 }
 0x4cb   : > { %2402 = vmatprep.subr.bf16.mxu0 (!%p1770_p3), %v2875_v47 }
 0x4ce   : > { %2404 = vmatpush3.bf16.msra.mxu0 (!%p1770_p3), %v2403_v60 }
 0x4cf   : > { %2405 = vmatprep.subr.bf16.mxu0 (!%p1770_p3), %v2875_v47 }
 0x4d2   : > { %2407 = vmatpush3.bf16.msra.mxu0 (!%p1770_p3), %v2406_v1 }
 0x4d3   : > { %2408 = vmatprep.subr.bf16.mxu0 (!%p1770_p3), %v2875_v47 }
 0x4d6   : > { %2410 = vmatpush3.bf16.msra.mxu0 (!%p1770_p3), %v2409_v9 }
 0x4d7   : > { %2411 = vmatprep.subr.bf16.mxu0 (!%p1770_p3), %v2875_v47 }
 0x4da   : > { %2413 = vmatpush3.bf16.msra.mxu0 (!%p1770_p3), %v2412_v17 }
 0x4db   : > { %2414 = vmatprep.subr.bf16.mxu0 (!%p1770_p3), %v2875_v47 }
 0x4de   : > { %2416 = vmatpush3.bf16.msra.mxu0 (!%p1770_p3), %v2415_v21 }
 0x54f   : > { %v1323_v37 = vpop.xlane.xlu1 %1322 }
 0x550   : > { %v1324_v38 = vadd.f32 %v1323_v37, %v1320_v36  ;;  %v1530_v37 = vld [vmem:[%s3569_s29 + $0x70] sm:$0xff] (!%p1770_p3) }
 0x552   : > { %1326 = vst.msk [vmem:[#allocation3] sm:$0x1] %vm1325_vm5, %v1324_v38  ;;  %v1531_v38 = vld [vmem:[%s3569_s29 + $0x78] sm:$0xff] (!%p1770_p3) }
 0x553   : > { %v2439_v39 = vpack.c.bf16 (!%p1770_p3), %v1531_v38, %v1530_v37 }
 0x555   : > { %2440 = vmatpush3.bf16.msra.mxu1 (!%p1770_p3), %v2439_v39 }
 0x559   : > { %v1416_v46 = vld [vmem:[#allocation3] sm:$0x1] (!%p1770_p3) }
 0x55a   : > { %2640 = vrcp.f32 (!%p1770_p3), %v1416_v46 }
 0x564   : > { %v2641_v24 = vpop.eup (!%p1770_p3), %2640 }
 0x565   : > { %1420 = vperm.xlu0 (!%p1770_p3), %2639, %v2641_v24  }
 0x591   : > { %1414 = sbr.rel (%p1770_p3) target bundleno = 1944 (0x798), region = 96 }
 0x594   : > { %v1404_v43 = vpop.f32.mrb[32].mxu0 }
 0x595   : > { %v1408_v44 = vadd.f32 %v1404_v43, %v1337_v41  ;;  %v2178_v45 = vpop.f32.mrb[33].mxu0 }
 0x597   : > { %1409 = vst [vmem:[#allocation4] sm:$0x1] %v1408_v44  ;;  %v1532_v44 = vld [vmem:[%s3571_s16] sm:$0x1] (!%p1770_p3) }
 0x59e   : > { %v1415_v32 = vld [vmem:[#allocation4] sm:$0x1] }
 0x5e4   : > { %v1421_v26 = vpop.permute.xlu0 %1420 }
 0x5e5   : > { %v1426_v35 = vrot.slane %v1421_v26, %v3375_v12 }
 0x5e7   : > { %v1427_v36 = vmul.f32 %v1426_v35, %v1415_v32 }
 0x5e9   : > { %2212 = vmatmul.mubr.f32.vlgmr.msra.gmra.mrb[0].mxu0 %v1427_v36 }
 0x6bc   : > { %v1511_v42 = vpop.f32.mrb[0].mxu0 }
 0x6bd   : > { %v1512_v41 = vadd.f32 %v1511_v42, %v1444_v40  ;;  %v2213_v43 = vpop.f32.mrb[1].mxu0 }
 0x6bf   : > { %v1515_v12 = vmax.f32 %v1512_v41, 0.0 }
 0x6c1   : > { %2247 = vmatmul.mubr.f32.vlgmr.msra.gmra.mrb[0].mxu1 %v1515_v12 }
 0x794   : > { %v1599_v45 = vpop.f32.mrb[0].mxu1 }
 0x795   : > { %v1600_v46 = vadd.f32 %v1599_v45, %v1532_v44  ;;  %v2248_v48 = vpop.f32.mrb[1].mxu1 }
 0x797   : > { %1604 = vst.msk [vmem:[#allocation17] sm:$0x1] %vm1603_vm7, %v1600_v46 }
 0x798 PF: > { %s1771_s20 = sshll.u32 %s2987_s0, 4  ;;  %s3572_s17 = sld [smem:[#allocation29_spill]] }
 0x799   : > { %s1618_s26 = sshll.u32 %s529_s28, 4  ;;  %s1606_s27 = scalar_lea.sflag [#allocation10], %s3171_s12  ;;  %s1619_s26 = int_to_ptr.vmem [resolvable:$true] %s1618_s26 }
 0x79a   : > { %s2756_s21 = scalar_lea.vmem %s1619_s26, 16  ;;  %s2878_s22 = smov [#allocation16]  }
 0x79b   : > { %p2757_p7 = scmp.ne.s32.totalorder %s1619_s26, %s2756_s21  ;;  %s2760_s18 = sshll.u32 %s2878_s22, 4  ;;  %s2761_s18 = int_to_ptr.vmem [resolvable:$false] %s2760_s18 }
 0x79c   : > { %s2762_s11 = scalar_lea.vmem %s2761_s18, 32  ;;  %p2763_p2 = scmp.lt.s32.totalorder %s1619_s26, %s2761_s18 }
 0x79d   : > { %p2758_p12 = pnand %p2757_p7, %p3120_p5  ;;  %p2764_p4 = scmp.lt.s32.totalorder %s2762_s11, %s2756_s21 }
 0x79e   : > { %s3462_s30 = scalar_lea.hbm %s3572_s17, %s1771_s20 }
 0x79f   : > { %p2759_p1 = pneg %p2758_p12  ;;  %p2765_p10 = por %p2764_p4, %p2763_p2 }
 0x7a1   : > { %p2766_p0 = pnand %p2765_p10, %p2759_p1 }
 0x7a3   : > { %2769 = shalt.err (!%p2766_p0)
}
 0x7a4   : > { %s2770_s12 = scalar_lea.hbm %s3462_s30, 16  ;;  %s2774_s20 = scalar_lea.hbm %s3572_s17, 64 }
 0x7a5   : > { %p2771_p11 = scmp.ne.s32.totalorder %s3462_s30, %s2770_s12  ;;  %p2775_p6 = scmp.lt.u32.totalorder %s3462_s30, %s3572_s17 }
 0x7a6   : > { %p2776_p8 = scmp.lt.u32.totalorder %s2774_s20, %s2770_s12  ;;  %p2778_p7 = scmp.lt.u32.totalorder %s2770_s12, %s3462_s30 }
 0x7a7   : > { %p2772_p9 = pnand %p2771_p11, %p3120_p5 }
 0x7a8   : > { %p2777_p3 = por %p2776_p8, %p2775_p6 }
 0x7a9   : > { %p2773_p13 = pneg %p2772_p9 }
 0x7aa   : > { %p2779_p12 = por %p2778_p7, %p2777_p3 }
 0x7ac   : > { %p2780_p1 = pnand %p2779_p12, %p2773_p13 }
 0x7ae   : > { %2783 = shalt.err (!%p2780_p1)
}
 0x7af   : > { %2455 = dma.vmem_to_hbm [thread:$0]  (%p3120_p5), %s1619_s26, 16, %s3462_s30, %s1606_s27  }
 0x7b0   : > { %s2879_s21 = smov [#allocation17]   ;;  %p3573_p4 = scmp.eq.s32.totalorder %s2987_s0, 3 }
 0x7b1   : > { %s1629_s22 = sshll.u32 %s2879_s21, 4  ;;  %s1630_s22 = int_to_ptr.vmem [resolvable:$true] %s1629_s22 }
 0x7b2   : > { %s2784_s18 = scalar_lea.vmem %s1630_s22, 16  ;;  %s2790_s11 = scalar_lea.vmem %s1630_s22, 32 }
 0x7b3   : > { %p2785_p2 = scmp.ne.s32.totalorder %s1630_s22, %s2784_s18  ;;  %p2791_p11 = scmp.lt.s32.totalorder %s1630_s22, %s1630_s22 }
 0x7b4   : > { %p2792_p9 = scmp.lt.s32.totalorder %s2790_s11, %s2784_s18 }
 0x7b5   : > { %p2786_p10 = pnand %p2785_p2, %p3573_p4 }
 0x7b6   : > { %p2793_p6 = por %p2792_p9, %p2791_p11 }
 0x7b7   : > { %p2787_p0 = pneg %p2786_p10 }
 0x7b9   : > { %p2794_p8 = pnand %p2793_p6, %p2787_p0 }
 0x7bb   : > { %2797 = shalt.err (!%p2794_p8)
}
 0x7bc   : > { %s3574_s14 = sld [smem:[#allocation30_spill]]  ;;  %p3575_p13 = pmov %p3573_p4 }
 0x7c2   : > { %s2798_s16 = scalar_lea.hbm %s3574_s14, 16 }
 0x7c3   : > { %p2799_p5 = scmp.ne.s32.totalorder %s3574_s14, %s2798_s16  ;;  %p2804_p12 = scmp.lt.u32.totalorder %s2798_s16, %s3574_s14 }
 0x7c5   : > { %p2800_p3 = pnand %p2799_p5, %p3575_p13 }
 0x7c7   : > { %p2801_p7 = pneg %p2800_p3 }
 0x7c9   : > { %p2806_p1 = pnand %p2804_p12, %p2801_p7 }
 0x7cb   : > { %2809 = shalt.err (!%p2806_p1)
}
 0x7cc   : > { %p3576_p2 = pmov %p3573_p4 }
 0x7ce   : > { %2457 = dma.vmem_to_hbm [thread:$0]  (%p3576_p2), %s1630_s22, 16, %s3574_s14, [#allocation18]  }
 0x7cf   : > { %p3577_p4 = pmov %p3576_p2 }
 0x7d0   : > { %p3578_p10 = pmov %p3576_p2 }
 0x7d1   : > { %2839 = dma.done.wait (%p3577_p4), [#allocation18], 16  }
 0x7d2   : > { %2841 = vsyncadd (%p3578_p10), [#allocation18], 4294967280 }
 0x7d3 PF: > { %s3579_s21 = sld [smem:[#allocation24_spill]]  ;;  %s3580_s18 = sld [smem:[#allocation25_spill]] }
 0x7d4   : > { %p2488_p0 = scmp.ge.s32.totalorder %s2860_s25, 2 }
 0x7d9   : > { %s1645_s11 = sand.u32 1, %s3579_s21   ;;  %p3581_p11 = scmp.ne.s32.totalorder %s3580_s18, 0 }
 0x7da   : > { %s1646_s12 = scalar_lea.sflag [#allocation10], %s1645_s11 }
 0x7db   : > { %p2476_p9 = pnand %p2488_p0, %p3581_p11 }
 0x7dd   : > { %2843 = dma.done.wait (!%p2476_p9), %s1646_s12, 16  }
 0x7de   : > { %2845 = vsyncadd (!%p2476_p9), %s1646_s12, 4294967280  ;;  %p35_p6 = scmp.ge.s32.totalorder %s3106_s15, 6   ;;  %s3582_s22 = smov %s2852_s23 }
 0x7df   : > { %s3583_s23 = smov %s2856_s24  ;;  %s3584_s24 = smov %s3116_s13 }
 0x7e0   : > { %s3585_s25 = smov %s3106_s15  ;;  %37 = sbr.rel (!%p35_p6) target bundleno = 15 (0xf), region = 145 }
 0x7e7   :  { %1650 = vsyncpa [#allocation9], 1 }
 0x7e8   :  { %1652 = vsyncpa [#allocation9 + $0x1], 1 }
 0x7e9   :  { %1653 = vsyncpa [#allocation12], 1 }
 0x7ea   :  { %1654 = vsyncpa [#allocation15], 1 }
 0x7eb   :  { %1655 = vsyncpa [#allocation10], 1 }
 0x7ec   :  { %1657 = vsyncpa [#allocation10 + $0x1], 1 }
 0x7ed   :  { %1658 = vsyncpa [#allocation18], 1 }

</bundles_post_ra>
